<compile_context>
chip_gen: v7x
topology: tpu7x:2x2x1
jax: 0.10.0
libtpu: 0.0.40
codegen_flags: <defaults>
</compile_context>

<pallas_src>
import math
import jax
import jax.numpy as jnp
from jax.experimental import pallas as pl
from jax.experimental.pallas import tpu as pltpu

# ---- small synthetic DistilBERT-like config (no checkpoint load) ----
VOCAB = 100
DIM = 32          # hidden size
N_LAYERS = 2
N_HEADS = 4
HD = DIM // N_HEADS
FFN = 64
MAX_POS = 64
LN_EPS = 1e-12
SEQ = 8
BATCH = 2


# ---------------- shared math helpers (in-kernel and JAX reference) ----------------
def _layer_norm(x, g, b, eps=LN_EPS):
    mu = jnp.mean(x, axis=-1, keepdims=True)
    var = jnp.mean((x - mu) ** 2, axis=-1, keepdims=True)
    return (x - mu) * jax.lax.rsqrt(var + eps) * g + b


def _gelu(x):
    # TODO(synk): HF DistilBERT uses exact erf-GELU; tanh approximation used for Mosaic-safe lowering.
    return jax.nn.gelu(x, approximate=True)


# ---------------- fully fused encoder kernel ----------------
def encoder_kernel(emb_ref, mask_ref, embln_ref, wqkv_ref, bqkv_ref,
                   wo_ref, w1_ref, b1_ref, w2_ref, vec_ref, o_ref):
    f32 = jnp.float32
    S = emb_ref.shape[1]

    # embedding LayerNorm (fused)
    eln = embln_ref[...]                                    # (2, DIM)
    x = _layer_norm(emb_ref[0], eln[0:1], eln[1:2])         # (S, DIM)
    m = mask_ref[0]                                         # (1, S) additive mask (0 / -1e9)

    for l in range(N_LAYERS):                               # static unroll over layers
        wqkv = wqkv_ref[l]                                  # (3*DIM, DIM) rows: [q|k|v], q pre-scaled
        bqkv = bqkv_ref[l]                                  # (3*DIM, 1)
        vl = vec_ref[l]                                     # (6, DIM): bo, ln1g, ln1b, b2, ln2g, ln2b
        bo, g1, be1, b2, g2, be2 = (vl[0:1], vl[1:2], vl[2:3],
                                    vl[3:4], vl[4:5], vl[5:6])

        # fused QKV projection, head-major layout: qkv[f, s] with f = proj*DIM + h*HD + d
        qkv = jax.lax.dot_general(wqkv, x, (((1,), (1,)), ((), ())),
                                  preferred_element_type=f32) + bqkv     # (3*DIM, S)

        # scores for all heads stacked along sublanes: row index = h*S + q
        s_parts = []
        for h in range(N_HEADS):
            qh = qkv[h * HD:(h + 1) * HD]                   # (HD, S)
            kh = qkv[DIM + h * HD:DIM + (h + 1) * HD]       # (HD, S)
            s_parts.append(jax.lax.dot_general(qh, kh, (((0,), (0,)), ((), ())),
                                               preferred_element_type=f32))  # (S, S)
        s = jnp.concatenate(s_parts, axis=0) + m            # (NH*S, S): one mask add

        # single softmax over keys; reciprocal on the EUP
        smax = jnp.max(s, axis=-1, keepdims=True)
        e = jnp.exp(s - smax)
        p = e * pl.reciprocal(jnp.sum(e, axis=-1, keepdims=True), approx=True)

        # context, head-major (DIM, S)
        ctx_parts = []
        for h in range(N_HEADS):
            vh = qkv[2 * DIM + h * HD:2 * DIM + (h + 1) * HD]   # (HD, S)
            ph = p[h * S:(h + 1) * S]                            # (S, S)
            ctx_parts.append(jax.lax.dot_general(vh, ph, (((1,), (1,)), ((), ())),
                                                 preferred_element_type=f32))  # (HD, S)
        ctx = jnp.concatenate(ctx_parts, axis=0)                 # (DIM, S)

        # output projection: (S, DIM) = ctx^T @ wo
        attn = jax.lax.dot_general(ctx, wo_ref[l], (((0,), (0,)), ((), ())),
                                   preferred_element_type=f32) + bo
        x1 = _layer_norm(x + attn, g1, be1)

        hmid = _gelu(jnp.dot(x1, w1_ref[l], preferred_element_type=f32) + b1_ref[l])  # (S, FFN)
        ffn = jnp.dot(hmid, w2_ref[l], preferred_element_type=f32) + b2               # (S, DIM)
        x = _layer_norm(x1 + ffn, g2, be2)

    # only the CLS row is written back
    o_ref[0] = x[0:1, :]


# ---------------- pallas_call wrapper ----------------
def _fixed_spec(shape):
    nd = len(shape)
    return pl.BlockSpec(shape, lambda b, _nd=nd: (0,) * _nd)


def run_encoder(packed, emb, mask_add):
    B, S, H = emb.shape
    in_specs = [
        pl.BlockSpec((1, S, H), lambda b: (b, 0, 0)),   # embeddings (per batch element)
        pl.BlockSpec((1, 1, S), lambda b: (b, 0, 0)),   # additive attention mask
        _fixed_spec(packed["emb_ln"].shape),
        _fixed_spec(packed["wqkv"].shape),
        _fixed_spec(packed["bqkv"].shape),
        _fixed_spec(packed["wo"].shape),
        _fixed_spec(packed["w1"].shape),
        _fixed_spec(packed["b1"].shape),
        _fixed_spec(packed["w2"].shape),
        _fixed_spec(packed["vec"].shape),
    ]
    out = pl.pallas_call(
        encoder_kernel,
        out_shape=jax.ShapeDtypeStruct((B, 1, H), jnp.float32),
        grid=(B,),
        in_specs=in_specs,
        out_specs=pl.BlockSpec((1, 1, H), lambda b: (b, 0, 0)),
        compiler_params=pltpu.CompilerParams(dimension_semantics=("parallel",)),
    )(emb, mask_add, packed["emb_ln"], packed["wqkv"], packed["bqkv"],
      packed["wo"], packed["w1"], packed["b1"], packed["w2"], packed["vec"])
    return out[:, 0, :]                                    # (B, DIM)


# ---------------- parameters (deterministic in-script init) ----------------
def init_params(key):
    def nxt():
        nonlocal key
        key, sub = jax.random.split(key)
        return sub

    def w(shape):
        return jax.random.normal(nxt(), shape, jnp.float32) * 0.02

    params = {
        "word_emb": w((VOCAB, DIM)),
        "pos_emb": w((MAX_POS, DIM)),
        "emb_ln_g": jnp.ones((DIM,), jnp.float32) + w((DIM,)),
        "emb_ln_b": w((DIM,)),
        "layers": [],
    }
    for _ in range(N_LAYERS):
        params["layers"].append({
            "wq": w((DIM, DIM)), "bq": w((DIM,)),
            "wk": w((DIM, DIM)), "bk": w((DIM,)),
            "wv": w((DIM, DIM)), "bv": w((DIM,)),
            "wo": w((DIM, DIM)), "bo": w((DIM,)),
            "ln1_g": jnp.ones((DIM,), jnp.float32) + w((DIM,)), "ln1_b": w((DIM,)),
            "w1": w((DIM, FFN)), "b1": w((FFN,)),
            "w2": w((FFN, DIM)), "b2": w((DIM,)),
            "ln2_g": jnp.ones((DIM,), jnp.float32) + w((DIM,)), "ln2_b": w((DIM,)),
        })
    return params


def pack_params(params):
    """One-time packing: fuse QKV (with 1/sqrt(hd) folded into Q), stack per-layer weights."""
    scale = 1.0 / math.sqrt(HD)
    wqkv, bqkv, wo, w1, b1, w2, vec = [], [], [], [], [], [], []
    for lp in params["layers"]:
        wqkv.append(jnp.concatenate([lp["wq"].T * scale, lp["wk"].T, lp["wv"].T], axis=0))  # (3*DIM, DIM)
        bqkv.append(jnp.concatenate([lp["bq"] * scale, lp["bk"], lp["bv"]], axis=0)[:, None])  # (3*DIM, 1)
        wo.append(lp["wo"])
        w1.append(lp["w1"])
        b1.append(lp["b1"][None, :])
        w2.append(lp["w2"])
        vec.append(jnp.stack([lp["bo"], lp["ln1_g"], lp["ln1_b"],
                              lp["b2"], lp["ln2_g"], lp["ln2_b"]], axis=0))                 # (6, DIM)
    return {
        "word_emb": params["word_emb"],
        "pos_emb": params["pos_emb"],
        "emb_ln": jnp.stack([params["emb_ln_g"], params["emb_ln_b"]], axis=0),              # (2, DIM)
        "wqkv": jnp.stack(wqkv), "bqkv": jnp.stack(bqkv), "wo": jnp.stack(wo),
        "w1": jnp.stack(w1), "b1": jnp.stack(b1), "w2": jnp.stack(w2), "vec": jnp.stack(vec),
    }


# ---------------- TextEncoder.forward equivalent ----------------
def text_encoder_forward(packed, input_ids, attention_mask):
    B, S = input_ids.shape
    # embedding gather stays as plain-JAX glue (no clean tiny-Pallas equivalent)
    emb = packed["word_emb"][input_ids] + packed["pos_emb"][:S][None, :, :]
    mask_add = (attention_mask.astype(jnp.float32) - 1.0) * 1e9      # 0 = attend, -1e9 = pad
    mask_add = mask_add[:, None, :]                                  # (B, 1, S)
    return run_encoder(packed, emb.astype(jnp.float32), mask_add)    # CLS: (B, DIM)


# ---------------- pure-JAX reference (same math) for correctness check ----------------
def reference_forward(params, input_ids, attention_mask):
    B, S = input_ids.shape
    x = params["word_emb"][input_ids] + params["pos_emb"][:S][None, :, :]
    x = _layer_norm(x.astype(jnp.float32), params["emb_ln_g"], params["emb_ln_b"])
    mask_add = (attention_mask.astype(jnp.float32) - 1.0) * 1e9      # (B, S)
    for lp in params["layers"]:
        q = (x @ lp["wq"] + lp["bq"]).reshape(B, S, N_HEADS, HD).transpose(0, 2, 1, 3)
        k = (x @ lp["wk"] + lp["bk"]).reshape(B, S, N_HEADS, HD).transpose(0, 2, 1, 3)
        v = (x @ lp["wv"] + lp["bv"]).reshape(B, S, N_HEADS, HD).transpose(0, 2, 1, 3)
        s = jnp.einsum("bhqd,bhkd->bhqk", q / math.sqrt(HD), k) + mask_add[:, None, None, :]
        p = jax.nn.softmax(s, axis=-1)
        ctx = jnp.einsum("bhqk,bhkd->bhqd", p, v).transpose(0, 2, 1, 3).reshape(B, S, DIM)
        x1 = _layer_norm(x + ctx @ lp["wo"] + lp["bo"], lp["ln1_g"], lp["ln1_b"])
        ff = _gelu(x1 @ lp["w1"] + lp["b1"]) @ lp["w2"] + lp["b2"]
        x = _layer_norm(x1 + ff, lp["ln2_g"], lp["ln2_b"])
    return x[:, 0]


if __name__ == "__main__":
    key = jax.random.PRNGKey(0)
    pkey, ikey = jax.random.split(key)
    params = init_params(pkey)
    packed = pack_params(params)

    input_ids = jax.random.randint(ikey, (BATCH, SEQ), 0, VOCAB, dtype=jnp.int32)
    attention_mask = jnp.ones((BATCH, SEQ), jnp.int32).at[1, SEQ - 2:].set(0)  # pad last 2 tokens of sample 1

    out = text_encoder_forward(packed, input_ids, attention_mask)
    out = jax.block_until_ready(out)

    ref = reference_forward(params, input_ids, attention_mask)
    assert out.shape == (BATCH, DIM), out.shape
    assert bool(jnp.all(jnp.isfinite(out)))
    err = float(jnp.max(jnp.abs(out - ref)))
    # slightly relaxed tolerance: softmax denominator uses EUP approx reciprocal
    assert err < 2e-3, err
    print("KERNEL_OK")
</pallas_src>

<mosaic_0001>
module attributes {stable_mosaic.version = 11 : i64} {
  func.func @encoder_kernel(%arg0: i32, %arg1: memref<1x8x32xf32, #tpu.memory_space<vmem>>, %arg2: memref<1x1x8xf32, #tpu.memory_space<vmem>>, %arg3: memref<2x32xf32, #tpu.memory_space<vmem>>, %arg4: memref<2x96x32xf32, #tpu.memory_space<vmem>>, %arg5: memref<2x96x1xf32, #tpu.memory_space<vmem>>, %arg6: memref<2x32x32xf32, #tpu.memory_space<vmem>>, %arg7: memref<2x32x64xf32, #tpu.memory_space<vmem>>, %arg8: memref<2x1x64xf32, #tpu.memory_space<vmem>>, %arg9: memref<2x64x32xf32, #tpu.memory_space<vmem>>, %arg10: memref<2x6x32xf32, #tpu.memory_space<vmem>>, %arg11: memref<1x1x32xf32, #tpu.memory_space<vmem>>) attributes {dimension_semantics = [#tpu.dimension_semantics<parallel>], iteration_bounds = array<i64: 2>, scalar_prefetch = 0 : i64, scratch_operands = 0 : i64, tpu.core_type = #tpu.core_type<tc>, window_params = [{transform_indices = @transform_0, window_bounds = array<i64: 1, 8, 32>}, {transform_indices = @transform_1, window_bounds = array<i64: 1, 1, 8>}, {pipeline_mode = #tpu.pipeline_mode<synchronous>, transform_indices = @transform_2, window_bounds = array<i64: 2, 32>}, {pipeline_mode = #tpu.pipeline_mode<synchronous>, transform_indices = @transform_3, window_bounds = array<i64: 2, 96, 32>}, {pipeline_mode = #tpu.pipeline_mode<synchronous>, transform_indices = @transform_4, window_bounds = array<i64: 2, 96, 1>}, {pipeline_mode = #tpu.pipeline_mode<synchronous>, transform_indices = @transform_5, window_bounds = array<i64: 2, 32, 32>}, {pipeline_mode = #tpu.pipeline_mode<synchronous>, transform_indices = @transform_6, window_bounds = array<i64: 2, 32, 64>}, {pipeline_mode = #tpu.pipeline_mode<synchronous>, transform_indices = @transform_7, window_bounds = array<i64: 2, 1, 64>}, {pipeline_mode = #tpu.pipeline_mode<synchronous>, transform_indices = @transform_8, window_bounds = array<i64: 2, 64, 32>}, {pipeline_mode = #tpu.pipeline_mode<synchronous>, transform_indices = @transform_9, window_bounds = array<i64: 2, 6, 32>}, {transform_indices = @transform_10, window_bounds = array<i64: 1, 1, 32>}]} {
    %c0 = arith.constant 0 : index
    %c0_0 = arith.constant 0 : index
    %0 = vector.load %arg3[%c0, %c0_0] : memref<2x32xf32, #tpu.memory_space<vmem>>, vector<2x32xf32>
    %c0_1 = arith.constant 0 : index
    %c0_2 = arith.constant 0 : index
    %c0_3 = arith.constant 0 : index
    %1 = vector.load %arg1[%c0_1, %c0_2, %c0_3] : memref<1x8x32xf32, #tpu.memory_space<vmem>>, vector<1x8x32xf32>
    %2 = vector.shape_cast %1 : vector<1x8x32xf32> to vector<8x32xf32>
    %3 = vector.extract_strided_slice %0 {offsets = [0, 0], sizes = [1, 32], strides = [1, 1]} : vector<2x32xf32> to vector<1x32xf32>
    %4 = vector.extract_strided_slice %0 {offsets = [1, 0], sizes = [1, 32], strides = [1, 1]} : vector<2x32xf32> to vector<1x32xf32>
    %cst = arith.constant dense<0.000000e+00> : vector<8xf32>
    %5 = vector.multi_reduction <add>, %2, %cst [1] : vector<8x32xf32> to vector<8xf32>
    %6 = vector.shape_cast %5 : vector<8xf32> to vector<8x1xf32>
    %cst_4 = arith.constant 3.200000e+01 : f32
    %7 = vector.broadcast %cst_4 : f32 to vector<8x1xf32>
    %8 = arith.divf %6, %7 : vector<8x1xf32>
    %9 = vector.broadcast %8 : vector<8x1xf32> to vector<8x32xf32>
    %10 = arith.subf %2, %9 : vector<8x32xf32>
    %11 = arith.mulf %10, %10 : vector<8x32xf32>
    %cst_5 = arith.constant dense<0.000000e+00> : vector<8xf32>
    %12 = vector.multi_reduction <add>, %11, %cst_5 [1] : vector<8x32xf32> to vector<8xf32>
    %13 = vector.shape_cast %12 : vector<8xf32> to vector<8x1xf32>
    %cst_6 = arith.constant 3.200000e+01 : f32
    %14 = vector.broadcast %cst_6 : f32 to vector<8x1xf32>
    %15 = arith.divf %13, %14 : vector<8x1xf32>
    %16 = vector.broadcast %8 : vector<8x1xf32> to vector<8x32xf32>
    %17 = arith.subf %2, %16 : vector<8x32xf32>
    %cst_7 = arith.constant 9.99999996E-13 : f32
    %18 = vector.broadcast %cst_7 : f32 to vector<8x1xf32>
    %19 = arith.addf %15, %18 : vector<8x1xf32>
    %20 = math.rsqrt %19 : vector<8x1xf32>
    %21 = vector.broadcast %20 : vector<8x1xf32> to vector<8x32xf32>
    %22 = arith.mulf %17, %21 : vector<8x32xf32>
    %23 = vector.broadcast %3 : vector<1x32xf32> to vector<8x32xf32>
    %24 = arith.mulf %22, %23 : vector<8x32xf32>
    %25 = vector.broadcast %4 : vector<1x32xf32> to vector<8x32xf32>
    %26 = arith.addf %24, %25 : vector<8x32xf32>
    %c0_8 = arith.constant 0 : index
    %c0_9 = arith.constant 0 : index
    %c0_10 = arith.constant 0 : index
    %27 = vector.load %arg2[%c0_8, %c0_9, %c0_10] : memref<1x1x8xf32, #tpu.memory_space<vmem>>, vector<1x1x8xf32>
    %28 = vector.shape_cast %27 : vector<1x1x8xf32> to vector<1x8xf32>
    %c0_11 = arith.constant 0 : index
    %c0_12 = arith.constant 0 : index
    %c0_13 = arith.constant 0 : index
    %29 = vector.load %arg4[%c0_11, %c0_12, %c0_13] : memref<2x96x32xf32, #tpu.memory_space<vmem>>, vector<1x96x32xf32>
    %30 = vector.shape_cast %29 : vector<1x96x32xf32> to vector<96x32xf32>
    %c0_14 = arith.constant 0 : index
    %c0_15 = arith.constant 0 : index
    %c0_16 = arith.constant 0 : index
    %31 = vector.load %arg5[%c0_14, %c0_15, %c0_16] : memref<2x96x1xf32, #tpu.memory_space<vmem>>, vector<1x96x1xf32>
    %32 = vector.shape_cast %31 : vector<1x96x1xf32> to vector<96x1xf32>
    %c0_17 = arith.constant 0 : index
    %c0_18 = arith.constant 0 : index
    %c0_19 = arith.constant 0 : index
    %33 = vector.load %arg10[%c0_17, %c0_18, %c0_19] : memref<2x6x32xf32, #tpu.memory_space<vmem>>, vector<1x6x32xf32>
    %34 = vector.shape_cast %33 : vector<1x6x32xf32> to vector<6x32xf32>
    %35 = vector.extract_strided_slice %34 {offsets = [0, 0], sizes = [1, 32], strides = [1, 1]} : vector<6x32xf32> to vector<1x32xf32>
    %36 = vector.extract_strided_slice %34 {offsets = [1, 0], sizes = [1, 32], strides = [1, 1]} : vector<6x32xf32> to vector<1x32xf32>
    %37 = vector.extract_strided_slice %34 {offsets = [2, 0], sizes = [1, 32], strides = [1, 1]} : vector<6x32xf32> to vector<1x32xf32>
    %38 = vector.extract_strided_slice %34 {offsets = [3, 0], sizes = [1, 32], strides = [1, 1]} : vector<6x32xf32> to vector<1x32xf32>
    %39 = vector.extract_strided_slice %34 {offsets = [4, 0], sizes = [1, 32], strides = [1, 1]} : vector<6x32xf32> to vector<1x32xf32>
    %40 = vector.extract_strided_slice %34 {offsets = [5, 0], sizes = [1, 32], strides = [1, 1]} : vector<6x32xf32> to vector<1x32xf32>
    %cst_20 = arith.constant dense<0.000000e+00> : vector<96x8xf32>
    %41 = tpu.matmul %30, %26, %cst_20 {dimension_numbers = #tpu.dot_dimension_numbers<[1], [1], [0], [0], [0, 0, 1, 0], [], []>} : vector<96x32xf32>, vector<8x32xf32>, vector<96x8xf32> -> vector<96x8xf32>
    %42 = vector.broadcast %32 : vector<96x1xf32> to vector<96x8xf32>
    %43 = arith.addf %41, %42 : vector<96x8xf32>
    %44 = vector.extract_strided_slice %43 {offsets = [0, 0], sizes = [8, 8], strides = [1, 1]} : vector<96x8xf32> to vector<8x8xf32>
    %45 = vector.extract_strided_slice %43 {offsets = [32, 0], sizes = [8, 8], strides = [1, 1]} : vector<96x8xf32> to vector<8x8xf32>
    %cst_21 = arith.constant dense<0.000000e+00> : vector<8x8xf32>
    %46 = tpu.matmul %44, %45, %cst_21 {dimension_numbers = #tpu.dot_dimension_numbers<[0], [0], [1], [1], [0, 1, 1, 1], [], []>} : vector<8x8xf32>, vector<8x8xf32>, vector<8x8xf32> -> vector<8x8xf32>
    %47 = vector.extract_strided_slice %43 {offsets = [8, 0], sizes = [8, 8], strides = [1, 1]} : vector<96x8xf32> to vector<8x8xf32>
    %48 = vector.extract_strided_slice %43 {offsets = [40, 0], sizes = [8, 8], strides = [1, 1]} : vector<96x8xf32> to vector<8x8xf32>
    %cst_22 = arith.constant dense<0.000000e+00> : vector<8x8xf32>
    %49 = tpu.matmul %47, %48, %cst_22 {dimension_numbers = #tpu.dot_dimension_numbers<[0], [0], [1], [1], [0, 1, 1, 1], [], []>} : vector<8x8xf32>, vector<8x8xf32>, vector<8x8xf32> -> vector<8x8xf32>
    %50 = vector.extract_strided_slice %43 {offsets = [16, 0], sizes = [8, 8], strides = [1, 1]} : vector<96x8xf32> to vector<8x8xf32>
    %51 = vector.extract_strided_slice %43 {offsets = [48, 0], sizes = [8, 8], strides = [1, 1]} : vector<96x8xf32> to vector<8x8xf32>
    %cst_23 = arith.constant dense<0.000000e+00> : vector<8x8xf32>
    %52 = tpu.matmul %50, %51, %cst_23 {dimension_numbers = #tpu.dot_dimension_numbers<[0], [0], [1], [1], [0, 1, 1, 1], [], []>} : vector<8x8xf32>, vector<8x8xf32>, vector<8x8xf32> -> vector<8x8xf32>
    %53 = vector.extract_strided_slice %43 {offsets = [24, 0], sizes = [8, 8], strides = [1, 1]} : vector<96x8xf32> to vector<8x8xf32>
    %54 = vector.extract_strided_slice %43 {offsets = [56, 0], sizes = [8, 8], strides = [1, 1]} : vector<96x8xf32> to vector<8x8xf32>
    %cst_24 = arith.constant dense<0.000000e+00> : vector<8x8xf32>
    %55 = tpu.matmul %53, %54, %cst_24 {dimension_numbers = #tpu.dot_dimension_numbers<[0], [0], [1], [1], [0, 1, 1, 1], [], []>} : vector<8x8xf32>, vector<8x8xf32>, vector<8x8xf32> -> vector<8x8xf32>
    %56 = tpu.concatenate %46, %49, %52, %55 in 0 : vector<8x8xf32>, vector<8x8xf32>, vector<8x8xf32>, vector<8x8xf32> -> vector<32x8xf32>
    %57 = vector.broadcast %28 : vector<1x8xf32> to vector<32x8xf32>
    %58 = arith.addf %56, %57 : vector<32x8xf32>
    %cst_25 = arith.constant dense<0xFF800000> : vector<32xf32>
    %59 = vector.multi_reduction <maximumf>, %58, %cst_25 [1] : vector<32x8xf32> to vector<32xf32>
    %60 = vector.shape_cast %59 : vector<32xf32> to vector<32x1xf32>
    %61 = vector.broadcast %60 : vector<32x1xf32> to vector<32x8xf32>
    %62 = arith.subf %58, %61 : vector<32x8xf32>
    %63 = math.exp %62 : vector<32x8xf32>
    %cst_26 = arith.constant dense<0.000000e+00> : vector<32xf32>
    %64 = vector.multi_reduction <add>, %63, %cst_26 [1] : vector<32x8xf32> to vector<32xf32>
    %65 = vector.shape_cast %64 : vector<32xf32> to vector<32x1xf32>
    %66 = tpu.reciprocal %65 {approx = true} : vector<32x1xf32> -> vector<32x1xf32>
    %67 = vector.broadcast %66 : vector<32x1xf32> to vector<32x8xf32>
    %68 = arith.mulf %63, %67 : vector<32x8xf32>
    %69 = vector.extract_strided_slice %43 {offsets = [64, 0], sizes = [8, 8], strides = [1, 1]} : vector<96x8xf32> to vector<8x8xf32>
    %70 = vector.extract_strided_slice %68 {offsets = [0, 0], sizes = [8, 8], strides = [1, 1]} : vector<32x8xf32> to vector<8x8xf32>
    %cst_27 = arith.constant dense<0.000000e+00> : vector<8x8xf32>
    %71 = tpu.matmul %69, %70, %cst_27 {dimension_numbers = #tpu.dot_dimension_numbers<[1], [1], [0], [0], [0, 0, 1, 0], [], []>} : vector<8x8xf32>, vector<8x8xf32>, vector<8x8xf32> -> vector<8x8xf32>
    %72 = vector.extract_strided_slice %43 {offsets = [72, 0], sizes = [8, 8], strides = [1, 1]} : vector<96x8xf32> to vector<8x8xf32>
    %73 = vector.extract_strided_slice %68 {offsets = [8, 0], sizes = [8, 8], strides = [1, 1]} : vector<32x8xf32> to vector<8x8xf32>
    %cst_28 = arith.constant dense<0.000000e+00> : vector<8x8xf32>
    %74 = tpu.matmul %72, %73, %cst_28 {dimension_numbers = #tpu.dot_dimension_numbers<[1], [1], [0], [0], [0, 0, 1, 0], [], []>} : vector<8x8xf32>, vector<8x8xf32>, vector<8x8xf32> -> vector<8x8xf32>
    %75 = vector.extract_strided_slice %43 {offsets = [80, 0], sizes = [8, 8], strides = [1, 1]} : vector<96x8xf32> to vector<8x8xf32>
    %76 = vector.extract_strided_slice %68 {offsets = [16, 0], sizes = [8, 8], strides = [1, 1]} : vector<32x8xf32> to vector<8x8xf32>
    %cst_29 = arith.constant dense<0.000000e+00> : vector<8x8xf32>
    %77 = tpu.matmul %75, %76, %cst_29 {dimension_numbers = #tpu.dot_dimension_numbers<[1], [1], [0], [0], [0, 0, 1, 0], [], []>} : vector<8x8xf32>, vector<8x8xf32>, vector<8x8xf32> -> vector<8x8xf32>
    %78 = vector.extract_strided_slice %43 {offsets = [88, 0], sizes = [8, 8], strides = [1, 1]} : vector<96x8xf32> to vector<8x8xf32>
    %79 = vector.extract_strided_slice %68 {offsets = [24, 0], sizes = [8, 8], strides = [1, 1]} : vector<32x8xf32> to vector<8x8xf32>
    %cst_30 = arith.constant dense<0.000000e+00> : vector<8x8xf32>
    %80 = tpu.matmul %78, %79, %cst_30 {dimension_numbers = #tpu.dot_dimension_numbers<[1], [1], [0], [0], [0, 0, 1, 0], [], []>} : vector<8x8xf32>, vector<8x8xf32>, vector<8x8xf32> -> vector<8x8xf32>
    %81 = tpu.concatenate %71, %74, %77, %80 in 0 : vector<8x8xf32>, vector<8x8xf32>, vector<8x8xf32>, vector<8x8xf32> -> vector<32x8xf32>
    %c0_31 = arith.constant 0 : index
    %c0_32 = arith.constant 0 : index
    %c0_33 = arith.constant 0 : index
    %82 = vector.load %arg6[%c0_31, %c0_32, %c0_33] : memref<2x32x32xf32, #tpu.memory_space<vmem>>, vector<1x32x32xf32>
    %83 = vector.shape_cast %82 : vector<1x32x32xf32> to vector<32x32xf32>
    %cst_34 = arith.constant dense<0.000000e+00> : vector<8x32xf32>
    %84 = tpu.matmul %81, %83, %cst_34 {dimension_numbers = #tpu.dot_dimension_numbers<[0], [0], [1], [1], [0, 1, 1, 1], [], []>} : vector<32x8xf32>, vector<32x32xf32>, vector<8x32xf32> -> vector<8x32xf32>
    %85 = vector.broadcast %35 : vector<1x32xf32> to vector<8x32xf32>
    %86 = arith.addf %84, %85 : vector<8x32xf32>
    %87 = arith.addf %26, %86 : vector<8x32xf32>
    %cst_35 = arith.constant dense<0.000000e+00> : vector<8xf32>
    %88 = vector.multi_reduction <add>, %87, %cst_35 [1] : vector<8x32xf32> to vector<8xf32>
    %89 = vector.shape_cast %88 : vector<8xf32> to vector<8x1xf32>
    %cst_36 = arith.constant 3.200000e+01 : f32
    %90 = vector.broadcast %cst_36 : f32 to vector<8x1xf32>
    %91 = arith.divf %89, %90 : vector<8x1xf32>
    %92 = vector.broadcast %91 : vector<8x1xf32> to vector<8x32xf32>
    %93 = arith.subf %87, %92 : vector<8x32xf32>
    %94 = arith.mulf %93, %93 : vector<8x32xf32>
    %cst_37 = arith.constant dense<0.000000e+00> : vector<8xf32>
    %95 = vector.multi_reduction <add>, %94, %cst_37 [1] : vector<8x32xf32> to vector<8xf32>
    %96 = vector.shape_cast %95 : vector<8xf32> to vector<8x1xf32>
    %cst_38 = arith.constant 3.200000e+01 : f32
    %97 = vector.broadcast %cst_38 : f32 to vector<8x1xf32>
    %98 = arith.divf %96, %97 : vector<8x1xf32>
    %99 = vector.broadcast %91 : vector<8x1xf32> to vector<8x32xf32>
    %100 = arith.subf %87, %99 : vector<8x32xf32>
    %cst_39 = arith.constant 9.99999996E-13 : f32
    %101 = vector.broadcast %cst_39 : f32 to vector<8x1xf32>
    %102 = arith.addf %98, %101 : vector<8x1xf32>
    %103 = math.rsqrt %102 : vector<8x1xf32>
    %104 = vector.broadcast %103 : vector<8x1xf32> to vector<8x32xf32>
    %105 = arith.mulf %100, %104 : vector<8x32xf32>
    %106 = vector.broadcast %36 : vector<1x32xf32> to vector<8x32xf32>
    %107 = arith.mulf %105, %106 : vector<8x32xf32>
    %108 = vector.broadcast %37 : vector<1x32xf32> to vector<8x32xf32>
    %109 = arith.addf %107, %108 : vector<8x32xf32>
    %c0_40 = arith.constant 0 : index
    %c0_41 = arith.constant 0 : index
    %c0_42 = arith.constant 0 : index
    %110 = vector.load %arg7[%c0_40, %c0_41, %c0_42] : memref<2x32x64xf32, #tpu.memory_space<vmem>>, vector<1x32x64xf32>
    %111 = vector.shape_cast %110 : vector<1x32x64xf32> to vector<32x64xf32>
    %cst_43 = arith.constant dense<0.000000e+00> : vector<8x64xf32>
    %112 = tpu.matmul %109, %111, %cst_43 {dimension_numbers = #tpu.dot_dimension_numbers<[1], [0], [0], [1], [0, 0, 1, 1], [], []>} : vector<8x32xf32>, vector<32x64xf32>, vector<8x64xf32> -> vector<8x64xf32>
    %c0_44 = arith.constant 0 : index
    %c0_45 = arith.constant 0 : index
    %c0_46 = arith.constant 0 : index
    %113 = vector.load %arg8[%c0_44, %c0_45, %c0_46] : memref<2x1x64xf32, #tpu.memory_space<vmem>>, vector<1x1x64xf32>
    %114 = vector.shape_cast %113 : vector<1x1x64xf32> to vector<1x64xf32>
    %115 = vector.broadcast %114 : vector<1x64xf32> to vector<8x64xf32>
    %116 = arith.addf %112, %115 : vector<8x64xf32>
    %117 = arith.mulf %116, %116 : vector<8x64xf32>
    %118 = arith.mulf %116, %117 : vector<8x64xf32>
    %cst_47 = arith.constant 4.471500e-02 : f32
    %119 = vector.broadcast %cst_47 : f32 to vector<8x64xf32>
    %120 = arith.mulf %119, %118 : vector<8x64xf32>
    %121 = arith.addf %116, %120 : vector<8x64xf32>
    %cst_48 = arith.constant 0.797884583 : f32
    %122 = vector.broadcast %cst_48 : f32 to vector<8x64xf32>
    %123 = arith.mulf %122, %121 : vector<8x64xf32>
    %124 = math.tanh %123 : vector<8x64xf32>
    %cst_49 = arith.constant 1.000000e+00 : f32
    %125 = vector.broadcast %cst_49 : f32 to vector<8x64xf32>
    %126 = arith.addf %125, %124 : vector<8x64xf32>
    %cst_50 = arith.constant 5.000000e-01 : f32
    %127 = vector.broadcast %cst_50 : f32 to vector<8x64xf32>
    %128 = arith.mulf %127, %126 : vector<8x64xf32>
    %129 = arith.mulf %116, %128 : vector<8x64xf32>
    %c0_51 = arith.constant 0 : index
    %c0_52 = arith.constant 0 : index
    %c0_53 = arith.constant 0 : index
    %130 = vector.load %arg9[%c0_51, %c0_52, %c0_53] : memref<2x64x32xf32, #tpu.memory_space<vmem>>, vector<1x64x32xf32>
    %131 = vector.shape_cast %130 : vector<1x64x32xf32> to vector<64x32xf32>
    %cst_54 = arith.constant dense<0.000000e+00> : vector<8x32xf32>
    %132 = tpu.matmul %129, %131, %cst_54 {dimension_numbers = #tpu.dot_dimension_numbers<[1], [0], [0], [1], [0, 0, 1, 1], [], []>} : vector<8x64xf32>, vector<64x32xf32>, vector<8x32xf32> -> vector<8x32xf32>
    %133 = vector.broadcast %38 : vector<1x32xf32> to vector<8x32xf32>
    %134 = arith.addf %132, %133 : vector<8x32xf32>
    %135 = arith.addf %109, %134 : vector<8x32xf32>
    %cst_55 = arith.constant dense<0.000000e+00> : vector<8xf32>
    %136 = vector.multi_reduction <add>, %135, %cst_55 [1] : vector<8x32xf32> to vector<8xf32>
    %137 = vector.shape_cast %136 : vector<8xf32> to vector<8x1xf32>
    %cst_56 = arith.constant 3.200000e+01 : f32
    %138 = vector.broadcast %cst_56 : f32 to vector<8x1xf32>
    %139 = arith.divf %137, %138 : vector<8x1xf32>
    %140 = vector.broadcast %139 : vector<8x1xf32> to vector<8x32xf32>
    %141 = arith.subf %135, %140 : vector<8x32xf32>
    %142 = arith.mulf %141, %141 : vector<8x32xf32>
    %cst_57 = arith.constant dense<0.000000e+00> : vector<8xf32>
    %143 = vector.multi_reduction <add>, %142, %cst_57 [1] : vector<8x32xf32> to vector<8xf32>
    %144 = vector.shape_cast %143 : vector<8xf32> to vector<8x1xf32>
    %cst_58 = arith.constant 3.200000e+01 : f32
    %145 = vector.broadcast %cst_58 : f32 to vector<8x1xf32>
    %146 = arith.divf %144, %145 : vector<8x1xf32>
    %147 = vector.broadcast %139 : vector<8x1xf32> to vector<8x32xf32>
    %148 = arith.subf %135, %147 : vector<8x32xf32>
    %cst_59 = arith.constant 9.99999996E-13 : f32
    %149 = vector.broadcast %cst_59 : f32 to vector<8x1xf32>
    %150 = arith.addf %146, %149 : vector<8x1xf32>
    %151 = math.rsqrt %150 : vector<8x1xf32>
    %152 = vector.broadcast %151 : vector<8x1xf32> to vector<8x32xf32>
    %153 = arith.mulf %148, %152 : vector<8x32xf32>
    %154 = vector.broadcast %39 : vector<1x32xf32> to vector<8x32xf32>
    %155 = arith.mulf %153, %154 : vector<8x32xf32>
    %156 = vector.broadcast %40 : vector<1x32xf32> to vector<8x32xf32>
    %157 = arith.addf %155, %156 : vector<8x32xf32>
    %c1 = arith.constant 1 : index
    %c0_60 = arith.constant 0 : index
    %c0_61 = arith.constant 0 : index
    %158 = vector.load %arg4[%c1, %c0_60, %c0_61] : memref<2x96x32xf32, #tpu.memory_space<vmem>>, vector<1x96x32xf32>
    %159 = vector.shape_cast %158 : vector<1x96x32xf32> to vector<96x32xf32>
    %c1_62 = arith.constant 1 : index
    %c0_63 = arith.constant 0 : index
    %c0_64 = arith.constant 0 : index
    %160 = vector.load %arg5[%c1_62, %c0_63, %c0_64] : memref<2x96x1xf32, #tpu.memory_space<vmem>>, vector<1x96x1xf32>
    %161 = vector.shape_cast %160 : vector<1x96x1xf32> to vector<96x1xf32>
    %c1_65 = arith.constant 1 : index
    %c0_66 = arith.constant 0 : index
    %c0_67 = arith.constant 0 : index
    %162 = vector.load %arg10[%c1_65, %c0_66, %c0_67] : memref<2x6x32xf32, #tpu.memory_space<vmem>>, vector<1x6x32xf32>
    %163 = vector.shape_cast %162 : vector<1x6x32xf32> to vector<6x32xf32>
    %164 = vector.extract_strided_slice %163 {offsets = [0, 0], sizes = [1, 32], strides = [1, 1]} : vector<6x32xf32> to vector<1x32xf32>
    %165 = vector.extract_strided_slice %163 {offsets = [1, 0], sizes = [1, 32], strides = [1, 1]} : vector<6x32xf32> to vector<1x32xf32>
    %166 = vector.extract_strided_slice %163 {offsets = [2, 0], sizes = [1, 32], strides = [1, 1]} : vector<6x32xf32> to vector<1x32xf32>
    %167 = vector.extract_strided_slice %163 {offsets = [3, 0], sizes = [1, 32], strides = [1, 1]} : vector<6x32xf32> to vector<1x32xf32>
    %168 = vector.extract_strided_slice %163 {offsets = [4, 0], sizes = [1, 32], strides = [1, 1]} : vector<6x32xf32> to vector<1x32xf32>
    %169 = vector.extract_strided_slice %163 {offsets = [5, 0], sizes = [1, 32], strides = [1, 1]} : vector<6x32xf32> to vector<1x32xf32>
    %cst_68 = arith.constant dense<0.000000e+00> : vector<96x8xf32>
    %170 = tpu.matmul %159, %157, %cst_68 {dimension_numbers = #tpu.dot_dimension_numbers<[1], [1], [0], [0], [0, 0, 1, 0], [], []>} : vector<96x32xf32>, vector<8x32xf32>, vector<96x8xf32> -> vector<96x8xf32>
    %171 = vector.broadcast %161 : vector<96x1xf32> to vector<96x8xf32>
    %172 = arith.addf %170, %171 : vector<96x8xf32>
    %173 = vector.extract_strided_slice %172 {offsets = [0, 0], sizes = [8, 8], strides = [1, 1]} : vector<96x8xf32> to vector<8x8xf32>
    %174 = vector.extract_strided_slice %172 {offsets = [32, 0], sizes = [8, 8], strides = [1, 1]} : vector<96x8xf32> to vector<8x8xf32>
    %cst_69 = arith.constant dense<0.000000e+00> : vector<8x8xf32>
    %175 = tpu.matmul %173, %174, %cst_69 {dimension_numbers = #tpu.dot_dimension_numbers<[0], [0], [1], [1], [0, 1, 1, 1], [], []>} : vector<8x8xf32>, vector<8x8xf32>, vector<8x8xf32> -> vector<8x8xf32>
    %176 = vector.extract_strided_slice %172 {offsets = [8, 0], sizes = [8, 8], strides = [1, 1]} : vector<96x8xf32> to vector<8x8xf32>
    %177 = vector.extract_strided_slice %172 {offsets = [40, 0], sizes = [8, 8], strides = [1, 1]} : vector<96x8xf32> to vector<8x8xf32>
    %cst_70 = arith.constant dense<0.000000e+00> : vector<8x8xf32>
    %178 = tpu.matmul %176, %177, %cst_70 {dimension_numbers = #tpu.dot_dimension_numbers<[0], [0], [1], [1], [0, 1, 1, 1], [], []>} : vector<8x8xf32>, vector<8x8xf32>, vector<8x8xf32> -> vector<8x8xf32>
    %179 = vector.extract_strided_slice %172 {offsets = [16, 0], sizes = [8, 8], strides = [1, 1]} : vector<96x8xf32> to vector<8x8xf32>
    %180 = vector.extract_strided_slice %172 {offsets = [48, 0], sizes = [8, 8], strides = [1, 1]} : vector<96x8xf32> to vector<8x8xf32>
    %cst_71 = arith.constant dense<0.000000e+00> : vector<8x8xf32>
    %181 = tpu.matmul %179, %180, %cst_71 {dimension_numbers = #tpu.dot_dimension_numbers<[0], [0], [1], [1], [0, 1, 1, 1], [], []>} : vector<8x8xf32>, vector<8x8xf32>, vector<8x8xf32> -> vector<8x8xf32>
    %182 = vector.extract_strided_slice %172 {offsets = [24, 0], sizes = [8, 8], strides = [1, 1]} : vector<96x8xf32> to vector<8x8xf32>
    %183 = vector.extract_strided_slice %172 {offsets = [56, 0], sizes = [8, 8], strides = [1, 1]} : vector<96x8xf32> to vector<8x8xf32>
    %cst_72 = arith.constant dense<0.000000e+00> : vector<8x8xf32>
    %184 = tpu.matmul %182, %183, %cst_72 {dimension_numbers = #tpu.dot_dimension_numbers<[0], [0], [1], [1], [0, 1, 1, 1], [], []>} : vector<8x8xf32>, vector<8x8xf32>, vector<8x8xf32> -> vector<8x8xf32>
    %185 = tpu.concatenate %175, %178, %181, %184 in 0 : vector<8x8xf32>, vector<8x8xf32>, vector<8x8xf32>, vector<8x8xf32> -> vector<32x8xf32>
    %186 = vector.broadcast %28 : vector<1x8xf32> to vector<32x8xf32>
    %187 = arith.addf %185, %186 : vector<32x8xf32>
    %cst_73 = arith.constant dense<0xFF800000> : vector<32xf32>
    %188 = vector.multi_reduction <maximumf>, %187, %cst_73 [1] : vector<32x8xf32> to vector<32xf32>
    %189 = vector.shape_cast %188 : vector<32xf32> to vector<32x1xf32>
    %190 = vector.broadcast %189 : vector<32x1xf32> to vector<32x8xf32>
    %191 = arith.subf %187, %190 : vector<32x8xf32>
    %192 = math.exp %191 : vector<32x8xf32>
    %cst_74 = arith.constant dense<0.000000e+00> : vector<32xf32>
    %193 = vector.multi_reduction <add>, %192, %cst_74 [1] : vector<32x8xf32> to vector<32xf32>
    %194 = vector.shape_cast %193 : vector<32xf32> to vector<32x1xf32>
    %195 = tpu.reciprocal %194 {approx = true} : vector<32x1xf32> -> vector<32x1xf32>
    %196 = vector.broadcast %195 : vector<32x1xf32> to vector<32x8xf32>
    %197 = arith.mulf %192, %196 : vector<32x8xf32>
    %198 = vector.extract_strided_slice %172 {offsets = [64, 0], sizes = [8, 8], strides = [1, 1]} : vector<96x8xf32> to vector<8x8xf32>
    %199 = vector.extract_strided_slice %197 {offsets = [0, 0], sizes = [8, 8], strides = [1, 1]} : vector<32x8xf32> to vector<8x8xf32>
    %cst_75 = arith.constant dense<0.000000e+00> : vector<8x8xf32>
    %200 = tpu.matmul %198, %199, %cst_75 {dimension_numbers = #tpu.dot_dimension_numbers<[1], [1], [0], [0], [0, 0, 1, 0], [], []>} : vector<8x8xf32>, vector<8x8xf32>, vector<8x8xf32> -> vector<8x8xf32>
    %201 = vector.extract_strided_slice %172 {offsets = [72, 0], sizes = [8, 8], strides = [1, 1]} : vector<96x8xf32> to vector<8x8xf32>
    %202 = vector.extract_strided_slice %197 {offsets = [8, 0], sizes = [8, 8], strides = [1, 1]} : vector<32x8xf32> to vector<8x8xf32>
    %cst_76 = arith.constant dense<0.000000e+00> : vector<8x8xf32>
    %203 = tpu.matmul %201, %202, %cst_76 {dimension_numbers = #tpu.dot_dimension_numbers<[1], [1], [0], [0], [0, 0, 1, 0], [], []>} : vector<8x8xf32>, vector<8x8xf32>, vector<8x8xf32> -> vector<8x8xf32>
    %204 = vector.extract_strided_slice %172 {offsets = [80, 0], sizes = [8, 8], strides = [1, 1]} : vector<96x8xf32> to vector<8x8xf32>
    %205 = vector.extract_strided_slice %197 {offsets = [16, 0], sizes = [8, 8], strides = [1, 1]} : vector<32x8xf32> to vector<8x8xf32>
    %cst_77 = arith.constant dense<0.000000e+00> : vector<8x8xf32>
    %206 = tpu.matmul %204, %205, %cst_77 {dimension_numbers = #tpu.dot_dimension_numbers<[1], [1], [0], [0], [0, 0, 1, 0], [], []>} : vector<8x8xf32>, vector<8x8xf32>, vector<8x8xf32> -> vector<8x8xf32>
    %207 = vector.extract_strided_slice %172 {offsets = [88, 0], sizes = [8, 8], strides = [1, 1]} : vector<96x8xf32> to vector<8x8xf32>
    %208 = vector.extract_strided_slice %197 {offsets = [24, 0], sizes = [8, 8], strides = [1, 1]} : vector<32x8xf32> to vector<8x8xf32>
    %cst_78 = arith.constant dense<0.000000e+00> : vector<8x8xf32>
    %209 = tpu.matmul %207, %208, %cst_78 {dimension_numbers = #tpu.dot_dimension_numbers<[1], [1], [0], [0], [0, 0, 1, 0], [], []>} : vector<8x8xf32>, vector<8x8xf32>, vector<8x8xf32> -> vector<8x8xf32>
    %210 = tpu.concatenate %200, %203, %206, %209 in 0 : vector<8x8xf32>, vector<8x8xf32>, vector<8x8xf32>, vector<8x8xf32> -> vector<32x8xf32>
    %c1_79 = arith.constant 1 : index
    %c0_80 = arith.constant 0 : index
    %c0_81 = arith.constant 0 : index
    %211 = vector.load %arg6[%c1_79, %c0_80, %c0_81] : memref<2x32x32xf32, #tpu.memory_space<vmem>>, vector<1x32x32xf32>
    %212 = vector.shape_cast %211 : vector<1x32x32xf32> to vector<32x32xf32>
    %cst_82 = arith.constant dense<0.000000e+00> : vector<8x32xf32>
    %213 = tpu.matmul %210, %212, %cst_82 {dimension_numbers = #tpu.dot_dimension_numbers<[0], [0], [1], [1], [0, 1, 1, 1], [], []>} : vector<32x8xf32>, vector<32x32xf32>, vector<8x32xf32> -> vector<8x32xf32>
    %214 = vector.broadcast %164 : vector<1x32xf32> to vector<8x32xf32>
    %215 = arith.addf %213, %214 : vector<8x32xf32>
    %216 = arith.addf %157, %215 : vector<8x32xf32>
    %cst_83 = arith.constant dense<0.000000e+00> : vector<8xf32>
    %217 = vector.multi_reduction <add>, %216, %cst_83 [1] : vector<8x32xf32> to vector<8xf32>
    %218 = vector.shape_cast %217 : vector<8xf32> to vector<8x1xf32>
    %cst_84 = arith.constant 3.200000e+01 : f32
    %219 = vector.broadcast %cst_84 : f32 to vector<8x1xf32>
    %220 = arith.divf %218, %219 : vector<8x1xf32>
    %221 = vector.broadcast %220 : vector<8x1xf32> to vector<8x32xf32>
    %222 = arith.subf %216, %221 : vector<8x32xf32>
    %223 = arith.mulf %222, %222 : vector<8x32xf32>
    %cst_85 = arith.constant dense<0.000000e+00> : vector<8xf32>
    %224 = vector.multi_reduction <add>, %223, %cst_85 [1] : vector<8x32xf32> to vector<8xf32>
    %225 = vector.shape_cast %224 : vector<8xf32> to vector<8x1xf32>
    %cst_86 = arith.constant 3.200000e+01 : f32
    %226 = vector.broadcast %cst_86 : f32 to vector<8x1xf32>
    %227 = arith.divf %225, %226 : vector<8x1xf32>
    %228 = vector.broadcast %220 : vector<8x1xf32> to vector<8x32xf32>
    %229 = arith.subf %216, %228 : vector<8x32xf32>
    %cst_87 = arith.constant 9.99999996E-13 : f32
    %230 = vector.broadcast %cst_87 : f32 to vector<8x1xf32>
    %231 = arith.addf %227, %230 : vector<8x1xf32>
    %232 = math.rsqrt %231 : vector<8x1xf32>
    %233 = vector.broadcast %232 : vector<8x1xf32> to vector<8x32xf32>
    %234 = arith.mulf %229, %233 : vector<8x32xf32>
    %235 = vector.broadcast %165 : vector<1x32xf32> to vector<8x32xf32>
    %236 = arith.mulf %234, %235 : vector<8x32xf32>
    %237 = vector.broadcast %166 : vector<1x32xf32> to vector<8x32xf32>
    %238 = arith.addf %236, %237 : vector<8x32xf32>
    %c1_88 = arith.constant 1 : index
    %c0_89 = arith.constant 0 : index
    %c0_90 = arith.constant 0 : index
    %239 = vector.load %arg7[%c1_88, %c0_89, %c0_90] : memref<2x32x64xf32, #tpu.memory_space<vmem>>, vector<1x32x64xf32>
    %240 = vector.shape_cast %239 : vector<1x32x64xf32> to vector<32x64xf32>
    %cst_91 = arith.constant dense<0.000000e+00> : vector<8x64xf32>
    %241 = tpu.matmul %238, %240, %cst_91 {dimension_numbers = #tpu.dot_dimension_numbers<[1], [0], [0], [1], [0, 0, 1, 1], [], []>} : vector<8x32xf32>, vector<32x64xf32>, vector<8x64xf32> -> vector<8x64xf32>
    %c1_92 = arith.constant 1 : index
    %c0_93 = arith.constant 0 : index
    %c0_94 = arith.constant 0 : index
    %242 = vector.load %arg8[%c1_92, %c0_93, %c0_94] : memref<2x1x64xf32, #tpu.memory_space<vmem>>, vector<1x1x64xf32>
    %243 = vector.shape_cast %242 : vector<1x1x64xf32> to vector<1x64xf32>
    %244 = vector.broadcast %243 : vector<1x64xf32> to vector<8x64xf32>
    %245 = arith.addf %241, %244 : vector<8x64xf32>
    %246 = arith.mulf %245, %245 : vector<8x64xf32>
    %247 = arith.mulf %245, %246 : vector<8x64xf32>
    %cst_95 = arith.constant 4.471500e-02 : f32
    %248 = vector.broadcast %cst_95 : f32 to vector<8x64xf32>
    %249 = arith.mulf %248, %247 : vector<8x64xf32>
    %250 = arith.addf %245, %249 : vector<8x64xf32>
    %cst_96 = arith.constant 0.797884583 : f32
    %251 = vector.broadcast %cst_96 : f32 to vector<8x64xf32>
    %252 = arith.mulf %251, %250 : vector<8x64xf32>
    %253 = math.tanh %252 : vector<8x64xf32>
    %cst_97 = arith.constant 1.000000e+00 : f32
    %254 = vector.broadcast %cst_97 : f32 to vector<8x64xf32>
    %255 = arith.addf %254, %253 : vector<8x64xf32>
    %cst_98 = arith.constant 5.000000e-01 : f32
    %256 = vector.broadcast %cst_98 : f32 to vector<8x64xf32>
    %257 = arith.mulf %256, %255 : vector<8x64xf32>
    %258 = arith.mulf %245, %257 : vector<8x64xf32>
    %c1_99 = arith.constant 1 : index
    %c0_100 = arith.constant 0 : index
    %c0_101 = arith.constant 0 : index
    %259 = vector.load %arg9[%c1_99, %c0_100, %c0_101] : memref<2x64x32xf32, #tpu.memory_space<vmem>>, vector<1x64x32xf32>
    %260 = vector.shape_cast %259 : vector<1x64x32xf32> to vector<64x32xf32>
    %cst_102 = arith.constant dense<0.000000e+00> : vector<8x32xf32>
    %261 = tpu.matmul %258, %260, %cst_102 {dimension_numbers = #tpu.dot_dimension_numbers<[1], [0], [0], [1], [0, 0, 1, 1], [], []>} : vector<8x64xf32>, vector<64x32xf32>, vector<8x32xf32> -> vector<8x32xf32>
    %262 = vector.broadcast %167 : vector<1x32xf32> to vector<8x32xf32>
    %263 = arith.addf %261, %262 : vector<8x32xf32>
    %264 = arith.addf %238, %263 : vector<8x32xf32>
    %cst_103 = arith.constant dense<0.000000e+00> : vector<8xf32>
    %265 = vector.multi_reduction <add>, %264, %cst_103 [1] : vector<8x32xf32> to vector<8xf32>
    %266 = vector.shape_cast %265 : vector<8xf32> to vector<8x1xf32>
    %cst_104 = arith.constant 3.200000e+01 : f32
    %267 = vector.broadcast %cst_104 : f32 to vector<8x1xf32>
    %268 = arith.divf %266, %267 : vector<8x1xf32>
    %269 = vector.broadcast %268 : vector<8x1xf32> to vector<8x32xf32>
    %270 = arith.subf %264, %269 : vector<8x32xf32>
    %271 = arith.mulf %270, %270 : vector<8x32xf32>
    %cst_105 = arith.constant dense<0.000000e+00> : vector<8xf32>
    %272 = vector.multi_reduction <add>, %271, %cst_105 [1] : vector<8x32xf32> to vector<8xf32>
    %273 = vector.shape_cast %272 : vector<8xf32> to vector<8x1xf32>
    %cst_106 = arith.constant 3.200000e+01 : f32
    %274 = vector.broadcast %cst_106 : f32 to vector<8x1xf32>
    %275 = arith.divf %273, %274 : vector<8x1xf32>
    %276 = vector.broadcast %268 : vector<8x1xf32> to vector<8x32xf32>
    %277 = arith.subf %264, %276 : vector<8x32xf32>
    %cst_107 = arith.constant 9.99999996E-13 : f32
    %278 = vector.broadcast %cst_107 : f32 to vector<8x1xf32>
    %279 = arith.addf %275, %278 : vector<8x1xf32>
    %280 = math.rsqrt %279 : vector<8x1xf32>
    %281 = vector.broadcast %280 : vector<8x1xf32> to vector<8x32xf32>
    %282 = arith.mulf %277, %281 : vector<8x32xf32>
    %283 = vector.broadcast %168 : vector<1x32xf32> to vector<8x32xf32>
    %284 = arith.mulf %282, %283 : vector<8x32xf32>
    %285 = vector.broadcast %169 : vector<1x32xf32> to vector<8x32xf32>
    %286 = arith.addf %284, %285 : vector<8x32xf32>
    %287 = vector.extract_strided_slice %286 {offsets = [0, 0], sizes = [1, 32], strides = [1, 1]} : vector<8x32xf32> to vector<1x32xf32>
    %c0_108 = arith.constant 0 : index
    %c0_109 = arith.constant 0 : index
    %c0_110 = arith.constant 0 : index
    %288 = vector.load %arg11[%c0_108, %c0_109, %c0_110] : memref<1x1x32xf32, #tpu.memory_space<vmem>>, vector<1x1x32xf32>
    %289 = vector.shape_cast %288 : vector<1x1x32xf32> to vector<1x32xf32>
    %290 = vector.shape_cast %287 : vector<1x32xf32> to vector<1x1x32xf32>
    tpu.vector_store %arg11[%c0_108, %c0_109, %c0_110], %290 {strides = array<i32>} : memref<1x1x32xf32, #tpu.memory_space<vmem>>, vector<1x1x32xf32>,
    return
  }
  func.func @transform_0(%arg0: i32) -> (i32, i32, i32) {
    %c0_i32 = arith.constant 0 : i32
    %c0_i32_0 = arith.constant 0 : i32
    %c0_i32_1 = arith.constant 0 : i32
    return %arg0, %c0_i32, %c0_i32_0 : i32, i32, i32
  }
  func.func @transform_1(%arg0: i32) -> (i32, i32, i32) {
    %c0_i32 = arith.constant 0 : i32
    %c0_i32_0 = arith.constant 0 : i32
    %c0_i32_1 = arith.constant 0 : i32
    return %arg0, %c0_i32, %c0_i32_0 : i32, i32, i32
  }
  func.func @transform_2(%arg0: i32) -> (i32, i32) {
    %c0_i32 = arith.constant 0 : i32
    %c0_i32_0 = arith.constant 0 : i32
    %c0_i32_1 = arith.constant 0 : i32
    return %c0_i32, %c0_i32_0 : i32, i32
  }
  func.func @transform_3(%arg0: i32) -> (i32, i32, i32) {
    %c0_i32 = arith.constant 0 : i32
    %c0_i32_0 = arith.constant 0 : i32
    %c0_i32_1 = arith.constant 0 : i32
    %c0_i32_2 = arith.constant 0 : i32
    return %c0_i32, %c0_i32_0, %c0_i32_1 : i32, i32, i32
  }
  func.func @transform_4(%arg0: i32) -> (i32, i32, i32) {
    %c0_i32 = arith.constant 0 : i32
    %c0_i32_0 = arith.constant 0 : i32
    %c0_i32_1 = arith.constant 0 : i32
    %c0_i32_2 = arith.constant 0 : i32
    return %c0_i32, %c0_i32_0, %c0_i32_1 : i32, i32, i32
  }
  func.func @transform_5(%arg0: i32) -> (i32, i32, i32) {
    %c0_i32 = arith.constant 0 : i32
    %c0_i32_0 = arith.constant 0 : i32
    %c0_i32_1 = arith.constant 0 : i32
    %c0_i32_2 = arith.constant 0 : i32
    return %c0_i32, %c0_i32_0, %c0_i32_1 : i32, i32, i32
  }
  func.func @transform_6(%arg0: i32) -> (i32, i32, i32) {
    %c0_i32 = arith.constant 0 : i32
    %c0_i32_0 = arith.constant 0 : i32
    %c0_i32_1 = arith.constant 0 : i32
    %c0_i32_2 = arith.constant 0 : i32
    return %c0_i32, %c0_i32_0, %c0_i32_1 : i32, i32, i32
  }
  func.func @transform_7(%arg0: i32) -> (i32, i32, i32) {
    %c0_i32 = arith.constant 0 : i32
    %c0_i32_0 = arith.constant 0 : i32
    %c0_i32_1 = arith.constant 0 : i32
    %c0_i32_2 = arith.constant 0 : i32
    return %c0_i32, %c0_i32_0, %c0_i32_1 : i32, i32, i32
  }
  func.func @transform_8(%arg0: i32) -> (i32, i32, i32) {
    %c0_i32 = arith.constant 0 : i32
    %c0_i32_0 = arith.constant 0 : i32
    %c0_i32_1 = arith.constant 0 : i32
    %c0_i32_2 = arith.constant 0 : i32
    return %c0_i32, %c0_i32_0, %c0_i32_1 : i32, i32, i32
  }
  func.func @transform_9(%arg0: i32) -> (i32, i32, i32) {
    %c0_i32 = arith.constant 0 : i32
    %c0_i32_0 = arith.constant 0 : i32
    %c0_i32_1 = arith.constant 0 : i32
    %c0_i32_2 = arith.constant 0 : i32
    return %c0_i32, %c0_i32_0, %c0_i32_1 : i32, i32, i32
  }
  func.func @transform_10(%arg0: i32) -> (i32, i32, i32) {
    %c0_i32 = arith.constant 0 : i32
    %c0_i32_0 = arith.constant 0 : i32
    %c0_i32_1 = arith.constant 0 : i32
    return %arg0, %c0_i32, %c0_i32_0 : i32, i32, i32
  }
}

</mosaic_0001>

<bundles_post_ra>
// kernel: tpu_custom_call.1
= control target key start
LH: loop header
LB: loop body
LE: loop exit
PB: predicated region body
PF: predicated region fallthrough
CT: control target
= control target key end

     0   :  { %15 = vsyncpa [#allocation3], 0  ;;  %s4484_s0 = inlined_call_operand.vmem [shape: f32[2,8,32], index: 0, kind: input, shape index: {}]   ;;  %s4485_s1 = inlined_call_operand.vmem [shape: f32[2,1,8], index: 1, kind: input, shape index: {}]   ;;  %s4486_s2 = inlined_call_operand.vmem [shape: f32[2,32], index: 2, kind: input, shape index: {}]   ;;  %s4487_s3 = inlined_call_operand.vmem [shape: f32[2,96,32], index: 3, kind: input, shape index: {}]   ;;  %s4488_s4 = inlined_call_operand.vmem [shape: f32[2,96,1], index: 4, kind: input, shape index: {}]   ;;  %s4489_s5 = inlined_call_operand.vmem [shape: f32[2,32,32], index: 5, kind: input, shape index: {}]   ;;  %s4490_s6 = inlined_call_operand.vmem [shape: f32[2,32,64], index: 6, kind: input, shape index: {}]   ;;  %s4491_s7 = inlined_call_operand.vmem [shape: f32[2,1,64], index: 7, kind: input, shape index: {}]   ;;  %s4492_s8 = inlined_call_operand.vmem [shape: f32[2,64,32], index: 8, kind: input, shape index: {}]   ;;  %s4493_s9 = inlined_call_operand.vmem [shape: f32[2,6,32], index: 9, kind: input, shape index: {}]   ;;  %s4494_s10 = inlined_call_operand.hbm [shape: f32[2,1,32], index: 10, kind: output, shape index: {}]  }
   0x1   :  { %17 = vsyncpa [#allocation3 + $0x1], 0  ;;  %s3880_s13 = smov 0   ;;  %s3882_s14 = smov 0  }
   0x2   :  { %s3884_s15 = smov 0   ;;  %s3886_s16 = smov 0  }
   0x3 LB: > { %s3901_s17 = sadd.s32 4294967295, %s3818_s16   ;;  %s3210_s18 = sadd.s32 4294967294, %s3818_s16   ;;  %s3818_s16 = sphi %s3886_s16, %s4500_s16   ;;  %s3814_s15 = sphi %s3884_s15, %s4499_s15   ;;  %s3810_s14 = sphi %s3882_s14, %s4498_s14   ;;  %s3806_s13 = sphi %s3880_s13, %s4497_s13  }
   0x4   : > { %s3905_s19 = sadd.s32 1, %s3818_s16   ;;  %s250_s20 = sadd.s32 1, %s3814_s15 }
   0x5   : > { %s247_s21 = ssub.s32 %s3818_s16, %s3905_s19  ;;  %p260_p0 = scmp.ne.s32.totalorder %s3814_s15, %s3810_s14 }
   0x6   : > { %p248_p1 = scmp.eq.s32.totalorder %s247_s21, 0  ;;  %p261_p2 = scmp.eq.s32.totalorder %s3901_s17, 1 }
   0x7   : > { %p266_p3 = scmp.ne.s32.totalorder %s3810_s14, %s3806_s13  ;;  %p267_p4 = scmp.eq.s32.totalorder %s3210_s18, 1 }
   0x8   : > { %s3916_s22 = scalar_select %p248_p1, %s3814_s15, %s250_s20  }
   0x9   : > { %p3918_p5 = por %p261_p2, %p260_p0  ;;  %p3922_p6 = por %p267_p4, %p266_p3 }
   0xa   : > { %p3213_p7 = scmp.ge.s32.totalorder %s3818_s16, 1  ;;  %p322_p8 = scmp.lt.s32.totalorder %s3818_s16, 3 }
   0xc   : > { %p323_p9 = pnand %p3213_p7, %p322_p8 }
   0xd   : > { %p361_p10 = scmp.lt.s32.totalorder (!%p323_p9), %s3901_s17, 1  ;;  %vm370_vm0 = vcmask (!%p323_p9), 261120   ;;  %v396_v7 = vld [vmem:[%s4487_s3] sm:$0xff] (!%p323_p9)  ;;  %v3820_v9 = vmov (!%p323_p9), 0   ;;  %v410_v10 = vld [vmem:[%s4488_s4 + $0x10] sm:$0xff] (!%p323_p9)  ;;  %v409_v11 = vld [vmem:[%s4488_s4 + $0x8] sm:$0xff] (!%p323_p9)  ;;  %v385_v19 = vlaneseq (!%p323_p9) }
   0xe   : > { %326 = sbr.rel (%p323_p9) target bundleno = 5405 (0x151d), region = 60  ;;  %3417 = vmatprep.mubr.msk.f32.mxu0 (!%p323_p9), %vm370_vm0, %v396_v7  ;;  %v408_v8 = vld [vmem:[%s4488_s4] sm:$0xff] (!%p323_p9)  ;;  %3708 = vset.pattern.permute.xlu1 (!%p323_p9), %v3820_v9  ;;  %v411_v12 = vld [vmem:[%s4488_s4 + $0x18] sm:$0xff] (!%p323_p9)  ;;  %v413_v14 = vld [vmem:[%s4488_s4 + $0x28] sm:$0xff] (!%p323_p9)  ;;  %v3821_v38 = vmov (!%p323_p9), 0.0   ;;  %vm3822_vm1 = vmmov (!%p323_p9), 0  }
   0xf   : > { %3709 = vset.pattern.permute.xlu0 (!%p323_p9), %v3820_v9  ;;  %423 = vperm.xlu1 (!%p323_p9), %3708, %v408_v8   ;;  %v412_v13 = vld [vmem:[%s4488_s4 + $0x20] sm:$0xff] (!%p323_p9)  ;;  %v414_v15 = vld [vmem:[%s4488_s4 + $0x30] sm:$0xff] (!%p323_p9)  ;;  %v415_v16 = vld [vmem:[%s4488_s4 + $0x38] sm:$0xff] (!%p323_p9)  ;;  %v3966_v21 = vshrl.u32 (!%p323_p9), %v385_v19, 7  ;;  %vm677_vm2 = vcmask (!%p323_p9), 64512   ;;  %vm1666_vm3 = vcmask (!%p323_p9), 523264  }
  0x10   : > { %v368_v23 = vld [vmem:[%s4486_s2] sm:$0x3] (!%p323_p9)  ;;  %v397_v31 = vld [vmem:[%s4487_s3 + $0x8] sm:$0xff] (!%p323_p9)  ;;  %v398_v32 = vld [vmem:[%s4487_s3 + $0x10] sm:$0xff] (!%p323_p9)  ;;  %3435 = vmatprep.subr.mxu1 (!%p323_p9), %v3821_v38  ;;  %3437 = vmatprep.mubr.msk.f32.mxu1 (!%p323_p9), %vm3822_vm1, %v3821_v38  ;;  %s359_s11 = sand.u32 (!%p323_p9), 1, %s3810_s14   ;;  %s3316_s12 = sshll.u32 (!%p323_p9), %s3901_s17, 4 }
  0x11   : > { %v3969_v22 = vsub.s32 (!%p323_p9), 0, %v3966_v21  ;;  %v3975_v24 = vsub.s32 (!%p323_p9), 1, %v3966_v21  ;;  %v399_v33 = vld [vmem:[%s4487_s3 + $0x18] sm:$0xff] (!%p323_p9)  ;;  %v400_v34 = vld [vmem:[%s4487_s3 + $0x20] sm:$0xff] (!%p323_p9)  ;;  %v401_v35 = vld [vmem:[%s4487_s3 + $0x28] sm:$0xff] (!%p323_p9)  ;;  %s360_s18 = scalar_lea.vmem (!%p323_p9), [#allocation2], %s359_s11 }
  0x12   : > { %v402_v36 = vld [vmem:[%s4487_s3 + $0x30] sm:$0xff] (!%p323_p9)  ;;  %v403_v37 = vld [vmem:[%s4487_s3 + $0x38] sm:$0xff] (!%p323_p9)  ;;  %v404_v57 = vld [vmem:[%s4487_s3 + $0x40] sm:$0xff] (!%p323_p9)  ;;  %vm3131_vm4 = vcmask (!%p323_p9), 253952   ;;  %s3134_s27 = scalar_lea.sflag (!%p323_p9), [#allocation3], %s359_s11 }
  0x13   : > { %428 = vperm.xlu1 (!%p323_p9), %3708, %v409_v11   ;;  %v388_v25 = vrot.slane (!%p323_p9), %v368_v23, %v3969_v22  ;;  %v393_v28 = vrot.slane (!%p323_p9), %v368_v23, %v3975_v24  ;;  %v405_v58 = vld [vmem:[%s4487_s3 + $0x48] sm:$0xff] (!%p323_p9) }
  0x15   : > { %s3930_s25 = scalar_select %p361_p10, %s3901_s17, 1 }
  0x16   : > { %s3824_s17 = smov [#allocation2]  }
  0x17   : > { %s3214_s26 = sshll.u32 %s3930_s25, 3  ;;  %438 = vperm.xlu1 %3708, %v411_v12   ;;  %s367_s20 = scalar_lea.vmem %s4485_s1, %s3930_s25 }
  0x18   : > { %s364_s29 = scalar_lea.vmem %s4484_s0, %s3214_s26  ;;  %v4055_v7 = vld [vmem:[%s367_s20] ss:$0 sm:$0xff]  ;;  %s3146_s20 = sshll.u32 %s360_s18, 4  ;;  %s4444_s20 = int_to_ptr.vmem [resolvable:$true] %s3146_s20 }
  0x19   : > { %v369_v0 = vld [vmem:[%s364_s29] sm:$0xff]  ;;  %s4442_s26 = scalar_lea.hbm %s4494_s10, %s3316_s12  ;;  %s3756_s28 = scalar_lea.vmem %s4444_s20, 16 }
  0x1a   : > { %v371_v1 = vsel %vm370_vm0, %v369_v0, 0.0  ;;  %p3757_p11 = scmp.ne.s32.totalorder %s4444_s20, %s3756_s28  ;;  %s3760_s29 = sshll.u32 %s3824_s17, 4  ;;  %s3761_s29 = int_to_ptr.vmem [resolvable:$false] %s3760_s29 }
  0x1b   : > { %372 = vadd.xlane.f32.xlu0 %v371_v1  ;;  %443 = vperm.xlu1 %3708, %v412_v13   ;;  %s3762_s30 = scalar_lea.vmem %s3761_s29, 32  ;;  %p3763_p0 = scmp.lt.s32.totalorder %s4444_s20, %s3761_s29 }
  0x1c   : > { %p3758_p12 = pnand %p3757_p11, %p3918_p5  ;;  %p3764_p1 = scmp.lt.s32.totalorder %s3762_s30, %s3756_s28 }
  0x1e   : > { %p3759_p13 = pneg %p3758_p12  ;;  %p3765_p2 = por %p3764_p1, %p3763_p0 }
  0x1f   : > { %448 = vperm.xlu1 %3708, %v413_v14  }
  0x20   : > { %p3766_p3 = pnand %p3765_p2, %p3759_p13 }
  0x23   : > { %453 = vperm.xlu1 %3708, %v414_v15  }
  0x27   : > { %458 = vperm.xlu1 %3708, %v415_v16  }
  0x8e   : > { %v424_v39 = vpop.permute.xlu1 %423 }
  0x92   : > { %v429_v40 = vpop.permute.xlu1 %428 }
  0x96   : > { %v439_v45 = vpop.permute.xlu1 %438 }
  0x9a   : > { %v444_v51 = vpop.permute.xlu1 %443 }
  0x9e   : > { %v449_v59 = vpop.permute.xlu1 %448 }
  0xa2   : > { %v454_v60 = vpop.permute.xlu1 %453 }
  0xa6   : > { %v459_v61 = vpop.permute.xlu1 %458 }
  0xa8   : > { %v373_v2 = vpop.xlane.xlu0 %372 }
  0xa9   : > { %v375_v3 = vmul.f32 0.03125, %v373_v2 }
  0xab   : > { %v376_v4 = vsub.f32 %v369_v0, %v375_v3 }
  0xad   : > { %v377_v5 = vmul.f32 %v376_v4, %v376_v4 }
  0xaf   : > { %v378_v6 = vsel %vm370_vm0, %v377_v5, 0.0  ;;  %v406_v5 = vld [vmem:[%s4487_s3 + $0x50] sm:$0xff] }
  0xb0   : > { %379 = vadd.xlane.f32.xlu0 %v378_v6  ;;  %v407_v6 = vld [vmem:[%s4487_s3 + $0x58] sm:$0xff] }
  0xc6   : > { %433 = vperm.xlu0 %3709, %v410_v10  }
 0x13d   : > { %v380_v17 = vpop.xlane.xlu0 %379 }
 0x13e   : > { %v381_v18 = vmul.f32 0.03125, %v380_v17 }
 0x140   : > { %v382_v20 = vadd.f32 1e-12, %v381_v18 }
 0x142   : > { %3710 = vrsqrt.f32 %v382_v20 }
 0x145   : > { %v434_v46 = vpop.permute.xlu0 %433 }
 0x14c   : > { %v3711_v26 = vpop.eup %3710 }
 0x14d   : > { %v384_v27 = vmul.f32 %v3711_v26, %v376_v4 }
 0x14f   : > { %v389_v29 = vmul.f32 %v388_v25, %v384_v27  ;;  %v416_v27 = vld [vmem:[%s4488_s4 + $0x40] sm:$0xff] }
 0x151   : > { %v3979_v30 = vadd.f32 %v393_v28, %v389_v29 }
 0x153   : > { %3415 = vmatprep.subr.msk.mxu0 %vm370_vm0, %v3979_v30 }
 0x154   : > { %3416 = vmatpush3.xpose.msk.msra.mxu0 %vm370_vm0, %v3979_v30 }
 0x155   : > { %3470 = vmatprep.subr.mxu0 %v3821_v38 }
 0x157   : > { %3418 = vmatmul.mubr.msk.f32.vlgmr.msra.gmra.mrb[0].mxu0 %vm370_vm0, %v397_v31 }
 0x158   : > { %3420 = vmatprep.mubr.msk.f32.mxu0 %vm370_vm0, %v398_v32 }
 0x15b   : > { %3421 = vmatmul.mubr.msk.f32.gmra.mrb[2].mxu0 %vm370_vm0, %v399_v33 }
 0x15c   : > { %3423 = vmatprep.mubr.msk.f32.mxu0 %vm370_vm0, %v400_v34 }
 0x15f   : > { %3424 = vmatmul.mubr.msk.f32.gmra.mrb[4].mxu0 %vm370_vm0, %v401_v35 }
 0x160   : > { %3426 = vmatprep.mubr.msk.f32.mxu0 %vm370_vm0, %v402_v36 }
 0x163   : > { %3427 = vmatmul.mubr.msk.f32.gmra.mrb[6].mxu0 %vm370_vm0, %v403_v37 }
 0x164   : > { %3429 = vmatprep.mubr.msk.f32.mxu0 %vm370_vm0, %v404_v57 }
 0x167   : > { %3430 = vmatmul.mubr.msk.f32.gmra.mrb[8].mxu0 %vm370_vm0, %v405_v58 }
 0x168   : > { %3432 = vmatprep.mubr.msk.f32.mxu0 %vm370_vm0, %v406_v5 }
 0x16b   : > { %3433 = vmatmul.mubr.msk.f32.gmra.mrb[10].mxu0 %vm370_vm0, %v407_v6 }
 0x16c   : > { %3472 = vmatprep.mubr.msk.f32.mxu0 %vm3822_vm1, %v3821_v38 }
 0x22a   : > { %v3419_v41 = vpop.f32.mrb[0].mxu0 }
 0x22b   : > { %v592_v42 = vadd.f32 %v3419_v41, %v429_v40  ;;  %v586_v43 = vpop.f32.mrb[1].mxu0 }
 0x22c   : > { %v587_v44 = vadd.f32 %v586_v43, %v424_v39 }
 0x22d   : > { %751 = vxpose.xlu0.b32.start.end [1/1] (short) (narrow) %v592_v42, 8 }
 0x22e   : > { %v3422_v47 = vpop.f32.mrb[2].mxu0  ;;  %645 = vxpose.xlu1.b32.start.end [1/1] (short) (narrow) %v587_v44, 8 }
 0x22f   : > { %v596_v48 = vpop.f32.mrb[3].mxu0  ;;  %v602_v53 = vadd.f32 %v3422_v47, %v439_v45 }
 0x230   : > { %v597_v49 = vadd.f32 %v596_v48, %v434_v46 }
 0x232   : > { %v3425_v50 = vpop.f32.mrb[4].mxu0  ;;  %856 = vxpose.xlu1.b32.start.end [1/1] (short) (narrow) %v597_v49, 8 }
 0x233   : > { %v606_v52 = vpop.f32.mrb[5].mxu0  ;;  %v612_v62 = vadd.f32 %v3425_v50, %v449_v59 }
 0x234   : > { %v607_v54 = vadd.f32 %v606_v52, %v444_v51  ;;  %v418_v52 = vld [vmem:[%s4488_s4 + $0x50] sm:$0xff] }
 0x236   : > { %v3428_v55 = vpop.f32.mrb[6].mxu0  ;;  %3436 = vmatpush3.msra.mxu1 %v607_v54  ;;  %961 = vxpose.xlu1.b32.start.end [1/1] (short) (narrow) %v602_v53, 8  ;;  %v419_v54 = vld [vmem:[%s4488_s4 + $0x58] sm:$0xff] }
 0x237   : > { %v616_v56 = vpop.f32.mrb[7].mxu0  ;;  %3440 = vmatprep.subr.mxu1 %v3821_v38  ;;  %v622_v3 = vadd.f32 %v3428_v55, %v459_v61 }
 0x238   : > { %v617_v1 = vadd.f32 %v616_v56, %v454_v60  ;;  %v417_v56 = vld [vmem:[%s4488_s4 + $0x48] sm:$0xff] }
 0x23a   : > { %v3431_v28 = vpop.f32.mrb[8].mxu0 }
 0x23b   : > { %v626_v29 = vpop.f32.mrb[9].mxu0 }
 0x23e   : > { %v3434_v53 = vpop.f32.mrb[10].mxu0 }
 0x23f   : > { %v636_v55 = vpop.f32.mrb[11].mxu0 }
 0x2ad   : > { %v767_v0 = vpop.trf.xlu0 }
 0x2ae   : > { %v661_v63 = vpop.trf.xlu1 }
 0x2af   : > { %3438 = vmatmul.mubr.msk.f32.vlgmr.msra.gmra.mrb[0].mxu1 %vm677_vm2, %v661_v63 }
 0x2b0   : > { %3441 = vmatpush3.msra.mxu1 %v612_v62  ;;  %3442 = vmatprep.mubr.msk.f32.mxu1 %vm3822_vm1, %v3821_v38 }
 0x2b1   : > { %3445 = vmatprep.subr.mxu1 %v3821_v38 }
 0x2b2   : > { %v872_v2 = vpop.trf.xlu1 }
 0x2b3   : > { %3443 = vmatmul.mubr.msk.f32.vlgmr.msra.gmra.mrb[2].mxu1 %vm677_vm2, %v767_v0 }
 0x2b4   : > { %3446 = vmatpush3.msra.mxu1 %v617_v1  ;;  %3447 = vmatprep.mubr.msk.f32.mxu1 %vm3822_vm1, %v3821_v38 }
 0x2b5   : > { %3450 = vmatprep.subr.mxu1 %v3821_v38 }
 0x2b6   : > { %v977_v4 = vpop.trf.xlu1 }
 0x2b7   : > { %3448 = vmatmul.mubr.msk.f32.vlgmr.msra.gmra.mrb[4].mxu1 %vm677_vm2, %v872_v2 }
 0x2b8   : > { %3451 = vmatpush3.msra.mxu1 %v622_v3  ;;  %3452 = vmatprep.mubr.msk.f32.mxu1 %vm3822_vm1, %v3821_v38 }
 0x2b9   : > { %3455 = vmatprep.subr.mxu1 %v3821_v38 }
 0x2bb   : > { %3453 = vmatmul.mubr.msk.f32.vlgmr.msra.gmra.mrb[6].mxu1 %vm677_vm2, %v977_v4 }
 0x2bc   : > { %3457 = vmatprep.mubr.msk.f32.mxu1 %vm3822_vm1, %v3821_v38 }
 0x382   : > { %v747_v8 = vpop.f32.mrb[0].mxu1 }
 0x383   : > { %v1072_v9 = vadd.f32 %v4055_v7, %v747_v8  ;;  %v3439_v10 = vpop.f32.mrb[1].mxu1 }
 0x385   : > { %v1076_v11 = vsel %vm677_vm2, %v1072_v9, -inf }
 0x386   : > { %1077 = vmax.xlane.f32.xlu1 %v1076_v11  ;;  %v852_v12 = vpop.f32.mrb[2].mxu1 }
 0x387   : > { %v1073_v13 = vadd.f32 %v4055_v7, %v852_v12  ;;  %v3444_v14 = vpop.f32.mrb[3].mxu1 }
 0x388   : > { %v1424_v14 = vld [vmem:[%s4489_s5] sm:$0xff] }
 0x389   : > { %v1079_v15 = vsel %vm677_vm2, %v1073_v13, -inf }
 0x38a   : > { %1080 = vmax.xlane.f32.xlu0 %v1079_v15  ;;  %v957_v16 = vpop.f32.mrb[4].mxu1  ;;  %v1425_v15 = vld [vmem:[%s4489_s5 + $0x8] sm:$0xff] }
 0x38b   : > { %v1074_v17 = vadd.f32 %v4055_v7, %v957_v16  ;;  %v3449_v18 = vpop.f32.mrb[5].mxu1  ;;  %v1426_v16 = vld [vmem:[%s4489_s5 + $0x10] sm:$0xff] }
 0x38c   : > { %v3618_v18 = vpack.c.bf16 %v1425_v15, %v1424_v14 }
 0x38d   : > { %v1082_v19 = vsel %vm677_vm2, %v1074_v17, -inf }
 0x38e   : > { %1083 = vmax.xlane.f32.xlu1 %v1082_v19  ;;  %v1062_v20 = vpop.f32.mrb[6].mxu1  ;;  %v1427_v19 = vld [vmem:[%s4489_s5 + $0x18] sm:$0xff] }
 0x38f   : > { %v1075_v23 = vadd.f32 %v4055_v7, %v1062_v20  ;;  %v3454_v25 = vpop.f32.mrb[7].mxu1  ;;  %v3621_v20 = vpack.c.bf16 %v1427_v19, %v1426_v16 }
 0x391   : > { %v1085_v26 = vsel %vm677_vm2, %v1075_v23, -inf }
 0x392   : > { %1086 = vmax.xlane.f32.xlu1 %v1085_v26 }
 0x3a3   : > { %463 = vperm.xlu1 %3708, %v416_v27  }
 0x413   : > { %v1078_v31 = vpop.xlane.xlu1 %1077 }
 0x414   : > { %v1088_v32 = vsub.f32 %v1072_v9, %v1078_v31 }
 0x416   : > { %v1092_v33 = vmul.f32 1.442695, %v1088_v32 }
 0x417   : > { %v1081_v34 = vpop.xlane.xlu0 %1080 }
 0x418   : > { %3712 = vpow2.f32 %v1092_v33  ;;  %v1089_v35 = vsub.f32 %v1073_v13, %v1081_v34  ;;  %v4121_v34 = vld [vmem:[%s4493_s9] sm:$0x3f] }
 0x41a   : > { %v1094_v36 = vmul.f32 1.442695, %v1089_v35  ;;  %v1431_v35 = vrot.slane %v4121_v34, %v3969_v22 }
 0x41b   : > { %v1084_v37 = vpop.xlane.xlu1 %1083 }
 0x41c   : > { %3714 = vpow2.f32 %v1094_v36  ;;  %v1090_v39 = vsub.f32 %v1074_v17, %v1084_v37  ;;  %v3823_v17 = vmov 0.0|0.0  }
 0x41e   : > { %v1096_v40 = vmul.f32 1.442695, %v1090_v39 }
 0x41f   : > { %v1087_v41 = vpop.xlane.xlu1 %1086 }
 0x420   : > { %3716 = vpow2.f32 %v1096_v40  ;;  %v1091_v42 = vsub.f32 %v1075_v23, %v1087_v41 }
 0x422   : > { %v3713_v43 = vpop.eup %3712  ;;  %v1098_v44 = vmul.f32 1.442695, %v1091_v42 }
 0x423   : > { %v1100_v45 = vsel %vm677_vm2, %v3713_v43, 0.0  ;;  %v464_v57 = vpop.permute.xlu1 %463 }
 0x424   : > { %3718 = vpow2.f32 %v1098_v44  ;;  %1101 = vadd.xlane.f32.xlu1 %v1100_v45  ;;  %v627_v1 = vadd.f32 %v626_v29, %v464_v57 }
 0x426   : > { %v3715_v46 = vpop.eup %3714 }
 0x427   : > { %v1103_v47 = vsel %vm677_vm2, %v3715_v46, 0.0 }
 0x428   : > { %1104 = vadd.xlane.f32.xlu0 %v1103_v47  ;;  %v1561_v47 = vld [vmem:[%s4490_s6] sm:$0xff] }
 0x42a   : > { %v3717_v48 = vpop.eup %3716 }
 0x42b   : > { %v1106_v49 = vsel %vm677_vm2, %v3717_v48, 0.0 }
 0x42c   : > { %1107 = vadd.xlane.f32.xlu1 %v1106_v49 }
 0x42e   : > { %v3719_v50 = vpop.eup %3718 }
 0x42f   : > { %v1109_v51 = vsel %vm677_vm2, %v3719_v50, 0.0 }
 0x430   : > { %1110 = vadd.xlane.f32.xlu0 %v1109_v51 }
 0x43d   : > { %473 = vperm.xlu1 %3708, %v418_v52  }
 0x441   : > { %478 = vperm.xlu1 %3708, %v419_v54  }
 0x446   : > { %468 = vperm.xlu0 %3709, %v417_v56   ;;  %v1554_v56 = vrot.slane %v4121_v34, %v3975_v24 }
 0x4b1   : > { %v1102_v58 = vpop.xlane.xlu1 %1101 }
 0x4b2   : > { %3720 = vrcp.f32 %v1102_v58 }
 0x4b5   : > { %v1105_v59 = vpop.xlane.xlu0 %1104 }
 0x4b6   : > { %3722 = vrcp.f32 %v1105_v59 }
 0x4b9   : > { %v1108_v60 = vpop.xlane.xlu1 %1107 }
 0x4ba   : > { %3724 = vrcp.f32 %v1108_v60 }
 0x4bc   : > { %v3721_v61 = vpop.eup %3720 }
 0x4bd   : > { %v1116_v62 = vmul.f32 %v3721_v61, %v3713_v43  ;;  %v1111_v63 = vpop.xlane.xlu0 %1110  ;;  %v474_v3 = vpop.permute.xlu1 %473 }
 0x4be   : > { %3726 = vrcp.f32 %v1111_v63  ;;  %v637_v12 = vadd.f32 %v636_v55, %v474_v3  ;;  %v1558_v55 = vsub.s32 2, %v3966_v21  ;;  %v1655_v63 = vld [vmem:[%s4492_s8 + $0x8] sm:$0xff] }
 0x4bf   : > { %3456 = vmatpush3.xpose.msk.msra.mxu1 %vm677_vm2, %v1116_v62  ;;  %v1654_v62 = vld [vmem:[%s4492_s8] sm:$0xff] }
 0x4c0   : > { %v3723_v0 = vpop.eup %3722  ;;  %3460 = vmatprep.subr.mxu1 %v3821_v38  ;;  %v1559_v59 = vrot.slane %v4121_v34, %v1558_v55 }
 0x4c1   : > { %v1117_v2 = vmul.f32 %v3723_v0, %v3715_v46  ;;  %v479_v11 = vpop.permute.xlu1 %478  ;;  %v3630_v0 = vpack.c.bf16 %v1655_v63, %v1654_v62  ;;  %v3246_v63 = vld [vmem:[%s4487_s3 + $0x68] sm:$0xff] }
 0x4c2   : > { %3458 = vmatmul.mubr.msk.f32.vlgmr.msra.gmra.mrb[8].mxu1 %vm677_vm2, %v627_v1  ;;  %v642_v13 = vadd.f32 %v3434_v53, %v479_v11  ;;  %v1656_v1 = vld [vmem:[%s4492_s8 + $0x10] sm:$0xff]  ;;  %v3242_v11 = vld [vmem:[%s4491_s7] ss:$0 sm:$0xff] }
 0x4c3   : > { %3461 = vmatpush3.xpose.msk.msra.mxu1 %vm677_vm2, %v1117_v2  ;;  %3462 = vmatprep.mubr.msk.f32.mxu1 %vm3822_vm1, %v3821_v38  ;;  %v1657_v2 = vld [vmem:[%s4492_s8 + $0x18] sm:$0xff] }
 0x4c4   : > { %v3725_v4 = vpop.eup %3724  ;;  %3465 = vmatprep.subr.mxu1 %v3821_v38  ;;  %v3633_v3 = vpack.c.bf16 %v1657_v2, %v1656_v1  ;;  %v3249_v1 = vld [vmem:[%s4487_s3 + $0x80] sm:$0xff]  ;;  %v3250_v2 = vld [vmem:[%s4487_s3 + $0x88] sm:$0xff] }
 0x4c5   : > { %v1118_v5 = vmul.f32 %v3725_v4, %v3717_v48  ;;  %v469_v6 = vpop.permute.xlu0 %468  ;;  %v1562_v48 = vld [vmem:[%s4490_s6 + $0x8] sm:$0xff]  ;;  %v1658_v4 = vld [vmem:[%s4492_s8 + $0x20] sm:$0xff] }
 0x4c6   : > { %v632_v8 = vadd.f32 %v3431_v28, %v469_v6  ;;  %v3624_v49 = vpack.c.bf16 %v1562_v48, %v1561_v47 }
 0x4c8   : > { %v3727_v9 = vpop.eup %3726  ;;  %3463 = vmatmul.mubr.msk.f32.vlgmr.msra.gmra.mrb[10].mxu1 %vm677_vm2, %v632_v8  ;;  %v1660_v8 = vld [vmem:[%s4492_s8 + $0x30] sm:$0xff] }
 0x4c9   : > { %v1119_v10 = vmul.f32 %v3727_v9, %v3719_v50  ;;  %3466 = vmatpush3.xpose.msk.msra.mxu1 %vm677_vm2, %v1118_v5  ;;  %3467 = vmatprep.mubr.msk.f32.mxu1 %vm3822_vm1, %v3821_v38  ;;  %v1564_v50 = vld [vmem:[%s4490_s6 + $0x18] sm:$0xff]  ;;  %v1659_v5 = vld [vmem:[%s4492_s8 + $0x28] sm:$0xff] }
 0x4ca   : > { %3629 = vmatprep.subr.bf16.mxu1 %v3823_v17  ;;  %v3636_v6 = vpack.c.bf16 %v1659_v5, %v1658_v4  ;;  %v1661_v9 = vld [vmem:[%s4492_s8 + $0x38] sm:$0xff] }
 0x4cb   : > { %3471 = vmatpush3.xpose.msk.msra.mxu0 %vm677_vm2, %v1119_v10  ;;  %v3639_v10 = vpack.c.bf16 %v1661_v9, %v1660_v8  ;;  %v3252_v4 = vld [vmem:[%s4487_s3 + $0x98] sm:$0xff] }
 0x4cc   : > { %3468 = vmatmul.mubr.msk.f32.vlgmr.msra.gmra.mrb[12].mxu1 %vm677_vm2, %v637_v12  ;;  %3617 = vmatprep.subr.bf16.mxu0 %v3823_v17 }
 0x4cd   : > { %3513 = vmatprep.mubr.msk.f32.mxu1 %vm3822_vm1, %v3821_v38  ;;  %3631 = vmatpush3.bf16.msra.mxu1 %v3630_v0  ;;  %v3247_v0 = vld [vmem:[%s4487_s3 + $0x70] sm:$0xff] }
 0x4ce   : > { %3473 = vmatmul.mubr.msk.f32.vlgmr.msra.gmra.mrb[12].mxu0 %vm677_vm2, %v642_v13  ;;  %3632 = vmatprep.subr.bf16.mxu1 %v3823_v17 }
 0x4cf   : > { %3483 = vmatprep.mubr.msk.f32.mxu0 %vm3822_vm1, %v3821_v38  ;;  %3619 = vmatpush3.bf16.msra.mxu0 %v3618_v18 }
 0x4d0   : > { %3620 = vmatprep.subr.bf16.mxu0 %v3823_v17 }
 0x4d1   : > { %3634 = vmatpush3.bf16.msra.mxu1 %v3633_v3  ;;  %v3251_v3 = vld [vmem:[%s4487_s3 + $0x90] sm:$0xff] }
 0x4d2   : > { %3635 = vmatprep.subr.bf16.mxu1 %v3823_v17 }
 0x4d3   : > { %3622 = vmatpush3.bf16.msra.mxu0 %v3621_v20 }
 0x4d4   : > { %3623 = vmatprep.subr.bf16.mxu0 %v3823_v17 }
 0x4d5   : > { %3637 = vmatpush3.bf16.msra.mxu1 %v3636_v6 }
 0x4d6   : > { %3638 = vmatprep.subr.bf16.mxu1 %v3823_v17 }
 0x4d9   : > { %3640 = vmatpush3.bf16.msra.mxu1 %v3639_v10 }
 0x4da   : > { %3536 = vmatprep.subr.mxu1 %v3821_v38 }
 0x595   : > { %v1192_v23 = vpop.f32.mrb[8].mxu1 }
 0x596   : > { %1432 = vxpose.xlu0.b32.start [1/4] (short) (narrow) %v1192_v23, 8  ;;  %v3459_v25 = vpop.f32.mrb[9].mxu1 }
 0x59b   : > { %v1268_v26 = vpop.f32.mrb[10].mxu1 }
 0x59c   : > { %1433 = vxpose.xlu0.b32.cont [2/4] (short) (narrow) %v1268_v26, 8  ;;  %v3464_v27 = vpop.f32.mrb[11].mxu1 }
 0x59f   : > { %v1344_v28 = vpop.f32.mrb[12].mxu1 }
 0x5a0   : > { %1434 = vxpose.xlu0.b32.cont [3/4] (short) (narrow) %v1344_v28, 8  ;;  %v3469_v29 = vpop.f32.mrb[13].mxu1  ;;  %v1664_v28 = vsub.s32 3, %v3966_v21 }
 0x5a1   : > { %v1420_v31 = vpop.f32.mrb[12].mxu0 }
 0x5a2   : > { %v3474_v32 = vpop.f32.mrb[13].mxu0  ;;  %v1665_v29 = vrot.slane %v4121_v34, %v1664_v28 }
 0x5a4   : > { %1435 = vxpose.xlu0.b32.end [4/4] (short) (narrow) %v1420_v31, 8 }
 0x618   : > { %v1448_v33 = vpop.trf.xlu0 }
 0x619   : > { %3484 = vmatmul.mubr.msk.f32.vlgmr.msra.gmra.mrb[14].mxu0 %vm370_vm0, %v1448_v33 }
 0x61a   : > { %3494 = vmatprep.mubr.msk.f32.mxu0 %vm3822_vm1, %v3821_v38  ;;  %3625 = vmatpush3.bf16.msra.mxu0 %v3624_v49 }
 0x61b   : > { %3626 = vmatprep.subr.bf16.mxu0 %v3823_v17 }
 0x6ec   : > { %v1533_v36 = vpop.f32.mrb[14].mxu0 }
 0x6ed   : > { %v1534_v37 = vadd.f32 %v1533_v36, %v1431_v35  ;;  %v3485_v39 = vpop.f32.mrb[15].mxu0 }
 0x6ee   : > { %v3258_v39 = vld [vmem:[%s4488_s4 + $0x68] sm:$0xff] }
 0x6ef   : > { %v1537_v40 = vadd.f32 %v1534_v37, %v3979_v30  ;;  %v1563_v30 = vld [vmem:[%s4490_s6 + $0x10] sm:$0xff]  ;;  %v3257_v37 = vld [vmem:[%s4488_s4 + $0x60] sm:$0xff] }
 0x6f0   : > { %v3627_v51 = vpack.c.bf16 %v1564_v50, %v1563_v30  ;;  %v3245_v50 = vld [vmem:[%s4487_s3 + $0x60] sm:$0xff] }
 0x6f1   : > { %v1538_v41 = vsel %vm370_vm0, %v1537_v40, 0.0 }
 0x6f2   : > { %1539 = vadd.xlane.f32.xlu1 %v1538_v41  ;;  %3628 = vmatpush3.bf16.msra.mxu0 %v3627_v51  ;;  %v3260_v41 = vld [vmem:[%s4488_s4 + $0x78] sm:$0xff] }
 0x77f   : > { %v1540_v42 = vpop.xlane.xlu1 %1539 }
 0x780   : > { %v1541_v43 = vmul.f32 0.03125, %v1540_v42  ;;  %v3261_v42 = vld [vmem:[%s4488_s4 + $0x80] sm:$0xff] }
 0x782   : > { %v1542_v44 = vsub.f32 %v1537_v40, %v1541_v43  ;;  %v3259_v40 = vld [vmem:[%s4488_s4 + $0x70] sm:$0xff]  ;;  %v3262_v43 = vld [vmem:[%s4488_s4 + $0x88] sm:$0xff] }
 0x784   : > { %v1543_v45 = vmul.f32 %v1542_v44, %v1542_v44 }
 0x786   : > { %v1544_v46 = vsel %vm370_vm0, %v1543_v45, 0.0  ;;  %v3264_v45 = vld [vmem:[%s4488_s4 + $0x98] sm:$0xff] }
 0x787   : > { %1545 = vadd.xlane.f32.xlu1 %v1544_v46 }
 0x814   : > { %v1546_v52 = vpop.xlane.xlu1 %1545 }
 0x815   : > { %v1547_v53 = vmul.f32 0.03125, %v1546_v52 }
 0x817   : > { %v1548_v54 = vadd.f32 1e-12, %v1547_v53 }
 0x819   : > { %3728 = vrsqrt.f32 %v1548_v54  ;;  %v1756_v54 = vsub.s32 4, %v3966_v21 }
 0x823   : > { %v3729_v57 = vpop.eup %3728 }
 0x824   : > { %v1550_v58 = vmul.f32 %v3729_v57, %v1542_v44  ;;  %v3263_v44 = vld [vmem:[%s4488_s4 + $0x90] sm:$0xff]  ;;  %v1757_v57 = vrot.slane %v4121_v34, %v1756_v54 }
 0x826   : > { %v1555_v60 = vmul.f32 %v1554_v56, %v1550_v58  ;;  %v1761_v56 = vsub.s32 5, %v3966_v21 }
 0x828   : > { %v1560_v61 = vadd.f32 %v1559_v59, %v1555_v60  ;;  %v1762_v60 = vrot.slane %v4121_v34, %v1761_v56  ;;  %v3248_v34 = vld [vmem:[%s4487_s3 + $0x78] sm:$0xff] }
 0x82a   : > { %3495 = vmatmul.mubr.msk.f32.vlgmr.msra.gmra.mrb[16].mxu0 %vm370_vm0, %v1560_v61 }
 0x82b   : > { %3518 = vmatprep.mubr.msk.f32.mxu0 %vm370_vm0, %v3245_v50 }
 0x8fd   : > { %v1641_v12 = vpop.f32.mrb[16].mxu0 }
 0x8fe   : > { %v1642_v13 = vadd.f32 %v3242_v11, %v1641_v12  ;;  %v3496_v14 = vpop.f32.mrb[17].mxu0 }
 0x900   : > { %v1645_v15 = vmul.f32 %v1642_v13, %v1642_v13 }
 0x902   : > { %v1646_v16 = vmul.f32 %v1645_v15, %v1642_v13 }
 0x904   : > { %v1647_v18 = vmul.f32 0.044715, %v1646_v16 }
 0x906   : > { %v1648_v19 = vadd.f32 %v1647_v18, %v1642_v13 }
 0x908   : > { %v1649_v20 = vmul.f32 0.7978846, %v1648_v19 }
 0x90a   : > { %3730 = vtanh.f32 %v1649_v20 }
 0x914   : > { %v3731_v23 = vpop.eup %3730 }
 0x915   : > { %v1651_v25 = vadd.f32 1.0, %v3731_v23 }
 0x917   : > { %v1652_v26 = vmul.f32 0.5, %v1651_v25  ;;  %v3253_v25 = vld [vmem:[%s4487_s3 + $0xa0] sm:$0xff] }
 0x919   : > { %v1653_v27 = vmul.f32 %v1652_v26, %v1642_v13  ;;  %v3254_v26 = vld [vmem:[%s4487_s3 + $0xa8] sm:$0xff] }
 0x91b   : > { %3514 = vmatmul.mubr.msk.f32.vlgmr.msra.gmra.mrb[14].mxu1 %vm1666_vm3, %v1653_v27 }
 0x91c   : > { %3538 = vmatprep.mubr.msk.f32.mxu1 %vm3822_vm1, %v3821_v38 }
 0x9ee   : > { %v1736_v31 = vpop.f32.mrb[14].mxu1 }
 0x9ef   : > { %v1737_v32 = vadd.f32 %v1736_v31, %v1665_v29  ;;  %v3515_v33 = vpop.f32.mrb[15].mxu1 }
 0x9f0   : > { %v3256_v33 = vld [vmem:[%s4487_s3 + $0xb8] sm:$0xff] }
 0x9f1   : > { %v1740_v35 = vadd.f32 %v1737_v32, %v1560_v61  ;;  %v3255_v32 = vld [vmem:[%s4487_s3 + $0xb0] sm:$0xff] }
 0x9f3   : > { %v1741_v36 = vsel %vm370_vm0, %v1740_v35, 0.0 }
 0x9f4   : > { %1742 = vadd.xlane.f32.xlu1 %v1741_v36 }
 0xa05   : > { %1794 = vperm.xlu1 %3708, %v3257_v37  }
 0xa09   : > { %1799 = vperm.xlu1 %3708, %v3258_v39  }
 0xa0d   : > { %1804 = vperm.xlu1 %3708, %v3259_v40  }
 0xa11   : > { %1809 = vperm.xlu1 %3708, %v3260_v41  }
 0xa15   : > { %1814 = vperm.xlu1 %3708, %v3261_v42  }
 0xa19   : > { %1819 = vperm.xlu1 %3708, %v3262_v43  }
 0xa1d   : > { %1824 = vperm.xlu1 %3708, %v3263_v44  }
 0xa21   : > { %1829 = vperm.xlu1 %3708, %v3264_v45  }
 0xa81   : > { %v1743_v46 = vpop.xlane.xlu1 %1742 }
 0xa82   : > { %v1744_v47 = vmul.f32 0.03125, %v1743_v46 }
 0xa84   : > { %v1745_v48 = vsub.f32 %v1740_v35, %v1744_v47 }
 0xa85   : > { %v1795_v5 = vpop.permute.xlu1 %1794 }
 0xa86   : > { %v1746_v49 = vmul.f32 %v1745_v48, %v1745_v48 }
 0xa88   : > { %v1747_v30 = vsel %vm370_vm0, %v1746_v49, 0.0 }
 0xa89   : > { %1748 = vadd.xlane.f32.xlu0 %v1747_v30  ;;  %v1800_v6 = vpop.permute.xlu1 %1799 }
 0xa8d   : > { %v1805_v8 = vpop.permute.xlu1 %1804 }
 0xa91   : > { %v1810_v9 = vpop.permute.xlu1 %1809 }
 0xa95   : > { %v1815_v10 = vpop.permute.xlu1 %1814 }
 0xa99   : > { %v1820_v11 = vpop.permute.xlu1 %1819 }
 0xa9d   : > { %v1825_v20 = vpop.permute.xlu1 %1824 }
 0xaa1   : > { %v1830_v35 = vpop.permute.xlu1 %1829 }
 0xb16   : > { %v1749_v51 = vpop.xlane.xlu0 %1748 }
 0xb17   : > { %v1750_v52 = vmul.f32 0.03125, %v1749_v51 }
 0xb19   : > { %v1751_v53 = vadd.f32 1e-12, %v1750_v52 }
 0xb1b   : > { %3732 = vrsqrt.f32 %v1751_v53 }
 0xb25   : > { %v3733_v58 = vpop.eup %3732 }
 0xb26   : > { %v1753_v59 = vmul.f32 %v3733_v58, %v1745_v48 }
 0xb28   : > { %v1758_v61 = vmul.f32 %v1757_v57, %v1753_v59 }
 0xb2a   : > { %v4224_v62 = vadd.f32 %v1762_v60, %v1758_v61 }
 0xb2c   : > { %3516 = vmatprep.subr.msk.mxu0 %vm370_vm0, %v4224_v62 }
 0xb2d   : > { %3517 = vmatpush3.xpose.msk.msra.mxu0 %vm370_vm0, %v4224_v62 }
 0xb2e   : > { %3551 = vmatprep.subr.mxu0 %v3821_v38 }
 0xb30   : > { %3519 = vmatmul.mubr.msk.f32.vlgmr.msra.gmra.mrb[18].mxu0 %vm370_vm0, %v3246_v63 }
 0xb31   : > { %3521 = vmatprep.mubr.msk.f32.mxu0 %vm370_vm0, %v3247_v0 }
 0xb34   : > { %3522 = vmatmul.mubr.msk.f32.gmra.mrb[20].mxu0 %vm370_vm0, %v3248_v34 }
 0xb35   : > { %3524 = vmatprep.mubr.msk.f32.mxu0 %vm370_vm0, %v3249_v1 }
 0xb38   : > { %3525 = vmatmul.mubr.msk.f32.gmra.mrb[22].mxu0 %vm370_vm0, %v3250_v2 }
 0xb39   : > { %3527 = vmatprep.mubr.msk.f32.mxu0 %vm370_vm0, %v3251_v3 }
 0xb3c   : > { %3528 = vmatmul.mubr.msk.f32.gmra.mrb[24].mxu0 %vm370_vm0, %v3252_v4 }
 0xb3d   : > { %3530 = vmatprep.mubr.msk.f32.mxu0 %vm370_vm0, %v3253_v25 }
 0xb40   : > { %3531 = vmatmul.mubr.msk.f32.gmra.mrb[26].mxu0 %vm370_vm0, %v3254_v26 }
 0xb41   : > { %3533 = vmatprep.mubr.msk.f32.mxu0 %vm370_vm0, %v3255_v32  ;;  %v3267_v32 = vld [vmem:[%s4488_s4 + $0xb0] sm:$0xff] }
 0xb44   : > { %3534 = vmatmul.mubr.msk.f32.gmra.mrb[28].mxu0 %vm370_vm0, %v3256_v33  ;;  %v3268_v33 = vld [vmem:[%s4488_s4 + $0xb8] sm:$0xff] }
 0xb45   : > { %3553 = vmatprep.mubr.msk.f32.mxu0 %vm3822_vm1, %v3821_v38 }
 0xc03   : > { %v3520_v12 = vpop.f32.mrb[18].mxu0 }
 0xc04   : > { %v1963_v13 = vadd.f32 %v3520_v12, %v1800_v6  ;;  %v1957_v14 = vpop.f32.mrb[19].mxu0 }
 0xc05   : > { %v1958_v15 = vadd.f32 %v1957_v14, %v1795_v5 }
 0xc06   : > { %2121 = vxpose.xlu1.b32.start.end [1/1] (short) (narrow) %v1963_v13, 8 }
 0xc07   : > { %v3523_v16 = vpop.f32.mrb[20].mxu0  ;;  %2016 = vxpose.xlu0.b32.start.end [1/1] (short) (narrow) %v1958_v15, 8 }
 0xc08   : > { %v1973_v18 = vadd.f32 %v3523_v16, %v1810_v9  ;;  %v1967_v19 = vpop.f32.mrb[21].mxu0 }
 0xc09   : > { %v1968_v23 = vadd.f32 %v1967_v19, %v1805_v8 }
 0xc0b   : > { %v3526_v27 = vpop.f32.mrb[22].mxu0  ;;  %2226 = vxpose.xlu1.b32.start.end [1/1] (short) (narrow) %v1968_v23, 8  ;;  %2331 = vxpose.xlu0.b32.start.end [1/1] (short) (narrow) %v1973_v18, 8 }
 0xc0c   : > { %v1977_v29 = vpop.f32.mrb[23].mxu0  ;;  %v1983_v40 = vadd.f32 %v3526_v27, %v1820_v11 }
 0xc0d   : > { %v1978_v31 = vadd.f32 %v1977_v29, %v1815_v10  ;;  %v3265_v29 = vld [vmem:[%s4488_s4 + $0xa0] sm:$0xff] }
 0xc0f   : > { %v3529_v36 = vpop.f32.mrb[24].mxu0  ;;  %3537 = vmatpush3.msra.mxu1 %v1978_v31  ;;  %v3266_v31 = vld [vmem:[%s4488_s4 + $0xa8] sm:$0xff] }
 0xc10   : > { %v1993_v37 = vadd.f32 %v3529_v36, %v1830_v35  ;;  %v1987_v39 = vpop.f32.mrb[25].mxu0  ;;  %3541 = vmatprep.subr.mxu1 %v3821_v38 }
 0xc11   : > { %v1988_v43 = vadd.f32 %v1987_v39, %v1825_v20 }
 0xc12   : > { %3552 = vmatpush3.msra.mxu0 %v1993_v37 }
 0xc13   : > { %3561 = vmatprep.subr.mxu0 %v3821_v38  ;;  %v4293_v46 = vpop.f32.mrb[26].mxu0 }
 0xc14   : > { %v4295_v47 = vpop.f32.mrb[27].mxu0 }
 0xc17   : > { %v4297_v48 = vpop.f32.mrb[28].mxu0 }
 0xc18   : > { %v4299_v49 = vpop.f32.mrb[29].mxu0 }
 0xc86   : > { %v2137_v42 = vpop.trf.xlu1 }
 0xc87   : > { %v2032_v41 = vpop.trf.xlu0 }
 0xc88   : > { %3539 = vmatmul.mubr.msk.f32.vlgmr.msra.gmra.mrb[16].mxu1 %vm677_vm2, %v2032_v41 }
 0xc89   : > { %3542 = vmatpush3.msra.mxu1 %v1983_v40  ;;  %3543 = vmatprep.mubr.msk.f32.mxu1 %vm3822_vm1, %v3821_v38 }
 0xc8a   : > { %3546 = vmatprep.subr.mxu1 %v3821_v38 }
 0xc8b   : > { %v2347_v44 = vpop.trf.xlu0  ;;  %v2242_v45 = vpop.trf.xlu1 }
 0xc8c   : > { %3544 = vmatmul.mubr.msk.f32.vlgmr.msra.gmra.mrb[18].mxu1 %vm677_vm2, %v2137_v42  ;;  %3554 = vmatmul.mubr.msk.f32.vlgmr.msra.gmra.mrb[30].mxu0 %vm677_vm2, %v2347_v44 }
 0xc8d   : > { %3547 = vmatpush3.msra.mxu1 %v1988_v43  ;;  %3548 = vmatprep.mubr.msk.f32.mxu1 %vm3822_vm1, %v3821_v38 }
 0xc8e   : > { %3556 = vmatprep.subr.mxu1 %v3821_v38  ;;  %3563 = vmatprep.mubr.msk.f32.mxu0 %vm3822_vm1, %v3821_v38 }
 0xc90   : > { %3549 = vmatmul.mubr.msk.f32.vlgmr.msra.gmra.mrb[20].mxu1 %vm677_vm2, %v2242_v45 }
 0xc91   : > { %3558 = vmatprep.mubr.msk.f32.mxu1 %vm3822_vm1, %v3821_v38 }
 0xd5b   : > { %v2117_v30 = vpop.f32.mrb[16].mxu1 }
 0xd5c   : > { %v2436_v50 = vadd.f32 %v4055_v7, %v2117_v30  ;;  %v3540_v51 = vpop.f32.mrb[17].mxu1 }
 0xd5e   : > { %v2440_v52 = vsel %vm677_vm2, %v2436_v50, -inf }
 0xd5f   : > { %2441 = vmax.xlane.f32.xlu1 %v2440_v52  ;;  %v2222_v53 = vpop.f32.mrb[18].mxu1  ;;  %v2432_v57 = vpop.f32.mrb[30].mxu0 }
 0xd60   : > { %v2437_v58 = vadd.f32 %v4055_v7, %v2222_v53  ;;  %v3545_v59 = vpop.f32.mrb[19].mxu1  ;;  %v3555_v60 = vpop.f32.mrb[31].mxu0  ;;  %v2439_v34 = vadd.f32 %v4055_v7, %v2432_v57 }
 0xd61   : > { %v3296_v60 = vld [vmem:[%s4489_s5 + $0x28] sm:$0xff] }
 0xd62   : > { %v2443_v61 = vsel %vm677_vm2, %v2437_v58, -inf  ;;  %v2449_v3 = vsel %vm677_vm2, %v2439_v34, -inf }
 0xd63   : > { %2444 = vmax.xlane.f32.xlu0 %v2443_v61  ;;  %v2327_v63 = vpop.f32.mrb[20].mxu1  ;;  %v3297_v61 = vld [vmem:[%s4489_s5 + $0x30] sm:$0xff] }
 0xd64   : > { %v2438_v0 = vadd.f32 %v4055_v7, %v2327_v63  ;;  %v3550_v1 = vpop.f32.mrb[21].mxu1  ;;  %v3298_v63 = vld [vmem:[%s4489_s5 + $0x38] sm:$0xff] }
 0xd66   : > { %v2446_v2 = vsel %vm677_vm2, %v2438_v0, -inf }
 0xd67   : > { %2447 = vmax.xlane.f32.xlu1 %v2446_v2 }
 0xd6b   : > { %2450 = vmax.xlane.f32.xlu1 %v2449_v3 }
 0xdec   : > { %v2442_v4 = vpop.xlane.xlu1 %2441 }
 0xded   : > { %v2452_v5 = vsub.f32 %v2436_v50, %v2442_v4 }
 0xdef   : > { %v2456_v6 = vmul.f32 1.442695, %v2452_v5 }
 0xdf0   : > { %v2445_v8 = vpop.xlane.xlu0 %2444 }
 0xdf1   : > { %3734 = vpow2.f32 %v2456_v6  ;;  %v2453_v11 = vsub.f32 %v2437_v58, %v2445_v8 }
 0xdf3   : > { %v2458_v15 = vmul.f32 1.442695, %v2453_v11 }
 0xdf4   : > { %v2448_v9 = vpop.xlane.xlu1 %2447 }
 0xdf5   : > { %v2454_v10 = vsub.f32 %v2438_v0, %v2448_v9  ;;  %v3645_v0 = vpack.c.bf16 %v3298_v63, %v3297_v61 }
 0xdf7   : > { %v2460_v12 = vmul.f32 1.442695, %v2454_v10  ;;  %v4369_v10 = vld [vmem:[%s4493_s9 + $0x8] sm:$0x3f] }
 0xdf8   : > { %v2451_v13 = vpop.xlane.xlu1 %2450  ;;  %v2796_v11 = vrot.slane %v4369_v10, %v3969_v22  ;;  %v3301_v22 = vld [vmem:[%s4490_s6 + $0x28] sm:$0xff] }
 0xdf9   : > { %3736 = vpow2.f32 %v2460_v12  ;;  %v2455_v14 = vsub.f32 %v2439_v34, %v2451_v13 }
 0xdfb   : > { %v3735_v7 = vpop.eup %3734  ;;  %v2462_v16 = vmul.f32 1.442695, %v2455_v14 }
 0xdfc   : > { %v2464_v18 = vsel %vm677_vm2, %v3735_v7, 0.0 }
 0xdfd   : > { %3738 = vpow2.f32 %v2462_v16  ;;  %2465 = vadd.xlane.f32.xlu0 %v2464_v18 }
 0xdfe   : > { %3740 = vpow2.f32 %v2458_v15 }
 0xe03   : > { %v3737_v19 = vpop.eup %3736 }
 0xe04   : > { %v2470_v20 = vsel %vm677_vm2, %v3737_v19, 0.0 }
 0xe05   : > { %2471 = vadd.xlane.f32.xlu0 %v2470_v20 }
 0xe07   : > { %v3739_v23 = vpop.eup %3738 }
 0xe08   : > { %v2473_v25 = vsel %vm677_vm2, %v3739_v23, 0.0  ;;  %v3741_v26 = vpop.eup %3740 }
 0xe09   : > { %2474 = vadd.xlane.f32.xlu1 %v2473_v25  ;;  %v2467_v27 = vsel %vm677_vm2, %v3741_v26, 0.0 }
 0xe0d   : > { %2468 = vadd.xlane.f32.xlu1 %v2467_v27 }
 0xe1b   : > { %1834 = vperm.xlu0 %3709, %v3265_v29  }
 0xe1e   : > { %1839 = vperm.xlu1 %3708, %v3266_v31  }
 0xe22   : > { %1844 = vperm.xlu1 %3708, %v3267_v32  }
 0xe26   : > { %1849 = vperm.xlu1 %3708, %v3268_v33   ;;  %v2919_v33 = vrot.slane %v4369_v10, %v3975_v24  ;;  %v3309_v24 = vld [vmem:[%s4492_s8 + $0x50] sm:$0xff] }
 0xe8a   : > { %v2466_v35 = vpop.xlane.xlu0 %2465 }
 0xe8b   : > { %3742 = vrcp.f32 %v2466_v35 }
 0xe92   : > { %v2472_v36 = vpop.xlane.xlu0 %2471 }
 0xe93   : > { %3744 = vrcp.f32 %v2472_v36 }
 0xe95   : > { %v3743_v37 = vpop.eup %3742 }
 0xe96   : > { %v2480_v39 = vmul.f32 %v3743_v37, %v3735_v7  ;;  %v2475_v40 = vpop.xlane.xlu1 %2474  ;;  %v2924_v37 = vrot.slane %v4369_v10, %v1558_v55  ;;  %v3310_v55 = vld [vmem:[%s4492_s8 + $0x58] sm:$0xff] }
 0xe98   : > { %3557 = vmatpush3.xpose.msk.msra.mxu1 %vm677_vm2, %v2480_v39 }
 0xe99   : > { %3566 = vmatprep.subr.mxu1 %v3821_v38 }
 0xe9a   : > { %v1835_v41 = vpop.permute.xlu0 %1834  ;;  %v2469_v42 = vpop.xlane.xlu1 %2468 }
 0xe9b   : > { %v1998_v43 = vadd.f32 %v4295_v47, %v1835_v41  ;;  %3746 = vrcp.f32 %v2469_v42  ;;  %v3307_v41 = vld [vmem:[%s4492_s8 + $0x40] sm:$0xff]  ;;  %v3308_v42 = vld [vmem:[%s4492_s8 + $0x48] sm:$0xff] }
 0xe9c   : > { %3748 = vrcp.f32 %v2475_v40 }
 0xe9d   : > { %v3745_v44 = vpop.eup %3744  ;;  %3559 = vmatmul.mubr.msk.f32.vlgmr.msra.gmra.mrb[22].mxu1 %vm677_vm2, %v1998_v43  ;;  %v3654_v43 = vpack.c.bf16 %v3308_v42, %v3307_v41 }
 0xe9e   : > { %v2482_v45 = vmul.f32 %v3745_v44, %v3737_v19  ;;  %v1840_v30 = vpop.permute.xlu1 %1839  ;;  %3568 = vmatprep.mubr.msk.f32.mxu1 %vm3822_vm1, %v3821_v38  ;;  %v3657_v44 = vpack.c.bf16 %v3310_v55, %v3309_v24 }
 0xe9f   : > { %v2003_v57 = vadd.f32 %v4293_v46, %v1840_v30  ;;  %v3295_v46 = vld [vmem:[%s4489_s5 + $0x20] sm:$0xff]  ;;  %v3312_v30 = vld [vmem:[%s4492_s8 + $0x68] sm:$0xff] }
 0xea0   : > { %3567 = vmatpush3.xpose.msk.msra.mxu1 %vm677_vm2, %v2482_v45  ;;  %v3311_v45 = vld [vmem:[%s4492_s8 + $0x60] sm:$0xff] }
 0xea1   : > { %3641 = vmatprep.subr.bf16.mxu1 %v3823_v17 }
 0xea2   : > { %v1845_v50 = vpop.permute.xlu1 %1844 }
 0xea3   : > { %v2008_v51 = vadd.f32 %v4299_v49, %v1845_v50  ;;  %v3660_v50 = vpack.c.bf16 %v3312_v30, %v3311_v45 }
 0xea5   : > { %v3747_v52 = vpop.eup %3746  ;;  %3569 = vmatmul.mubr.msk.f32.vlgmr.msra.gmra.mrb[24].mxu1 %vm677_vm2, %v2008_v51  ;;  %v3313_v51 = vld [vmem:[%s4492_s8 + $0x70] sm:$0xff] }
 0xea6   : > { %v2481_v47 = vmul.f32 %v3747_v52, %v3741_v26  ;;  %3584 = vmatprep.mubr.msk.f32.mxu1 %vm3822_vm1, %v3821_v38  ;;  %v3749_v53 = vpop.eup %3748  ;;  %v1850_v59 = vpop.permute.xlu1 %1849  ;;  %v3303_v26 = vld [vmem:[%s4490_s6 + $0x38] sm:$0xff] }
 0xea7   : > { %v2483_v58 = vmul.f32 %v3749_v53, %v3739_v23  ;;  %v2013_v49 = vadd.f32 %v4297_v48, %v1850_v59  ;;  %v3642_v48 = vpack.c.bf16 %v3296_v60, %v3295_v46  ;;  %v3300_v23 = vld [vmem:[%s4490_s6 + $0x20] sm:$0xff]  ;;  %v3314_v52 = vld [vmem:[%s4492_s8 + $0x78] sm:$0xff] }
 0xea8   : > { %3562 = vmatpush3.xpose.msk.msra.mxu0 %vm677_vm2, %v2481_v47  ;;  %v3648_v25 = vpack.c.bf16 %v3301_v22, %v3300_v23  ;;  %v3663_v47 = vpack.c.bf16 %v3314_v52, %v3313_v51  ;;  %v3305_v53 = vld [vmem:[%s4491_s7 + $0x1] ss:$0 sm:$0xff] }
 0xea9   : > { %3571 = vmatprep.subr.mxu0 %v3821_v38  ;;  %3643 = vmatpush3.bf16.msra.mxu1 %v3642_v48 }
 0xeaa   : > { %3644 = vmatprep.subr.bf16.mxu1 %v3823_v17 }
 0xeab   : > { %3564 = vmatmul.mubr.msk.f32.vlgmr.msra.gmra.mrb[32].mxu0 %vm677_vm2, %v2003_v57 }
 0xeac   : > { %3572 = vmatpush3.xpose.msk.msra.mxu0 %vm677_vm2, %v2483_v58  ;;  %3573 = vmatprep.mubr.msk.f32.mxu0 %vm3822_vm1, %v3821_v38 }
 0xead   : > { %3647 = vmatprep.subr.bf16.mxu0 %v3823_v17  ;;  %3646 = vmatpush3.bf16.msra.mxu1 %v3645_v0 }
 0xeae   : > { %3653 = vmatprep.subr.bf16.mxu1 %v3823_v17 }
 0xeaf   : > { %3574 = vmatmul.mubr.msk.f32.vlgmr.msra.gmra.mrb[34].mxu0 %vm677_vm2, %v2013_v49 }
 0xeb0   : > { %3595 = vmatprep.mubr.msk.f32.mxu0 %vm3822_vm1, %v3821_v38  ;;  %3649 = vmatpush3.bf16.msra.mxu0 %v3648_v25 }
 0xeb1   : > { %3650 = vmatprep.subr.bf16.mxu0 %v3823_v17 }
 0xf70   : > { %v2556_v34 = vpop.f32.mrb[22].mxu1 }
 0xf71   : > { %2797 = vxpose.xlu0.b32.start [1/4] (short) (narrow) %v2556_v34, 8  ;;  %v3560_v1 = vpop.f32.mrb[23].mxu1 }
 0xf72   : > { %v3033_v1 = vrot.slane %v4369_v10, %v1664_v28  ;;  %v3124_v28 = vrot.slane %v4369_v10, %v1756_v54 }
 0xf78   : > { %v2708_v2 = vpop.f32.mrb[24].mxu1 }
 0xf79   : > { %v3570_v3 = vpop.f32.mrb[25].mxu1 }
 0xf7e   : > { %v2632_v4 = vpop.f32.mrb[32].mxu0 }
 0xf7f   : > { %v3565_v5 = vpop.f32.mrb[33].mxu0  ;;  %2798 = vxpose.xlu0.b32.cont [2/4] (short) (narrow) %v2632_v4, 8 }
 0xf82   : > { %v2784_v6 = vpop.f32.mrb[34].mxu0 }
 0xf83   : > { %v3575_v8 = vpop.f32.mrb[35].mxu0  ;;  %2799 = vxpose.xlu0.b32.cont [3/4] (short) (narrow) %v2708_v2, 8 }
 0xf87   : > { %2800 = vxpose.xlu0.b32.end [4/4] (short) (narrow) %v2784_v6, 8 }
 0xffb   : > { %v2813_v9 = vpop.trf.xlu0 }
 0xffc   : > { %3585 = vmatmul.mubr.msk.f32.vlgmr.msra.gmra.mrb[26].mxu1 %vm370_vm0, %v2813_v9 }
 0xffd   : > { %3614 = vmatprep.mubr.msk.f32.mxu1 %vm3822_vm1, %v3821_v38  ;;  %3655 = vmatpush3.bf16.msra.mxu1 %v3654_v43 }
 0xffe   : > { %3656 = vmatprep.subr.bf16.mxu1 %v3823_v17 }
0x1001   : > { %3658 = vmatpush3.bf16.msra.mxu1 %v3657_v44 }
0x1002   : > { %3659 = vmatprep.subr.bf16.mxu1 %v3823_v17 }
0x1005   : > { %3661 = vmatpush3.bf16.msra.mxu1 %v3660_v50 }
0x1006   : > { %3662 = vmatprep.subr.bf16.mxu1 %v3823_v17 }
0x1009   : > { %3664 = vmatpush3.bf16.msra.mxu1 %v3663_v47 }
0x10cf   : > { %v2898_v12 = vpop.f32.mrb[26].mxu1 }
0x10d0   : > { %v2899_v13 = vadd.f32 %v2898_v12, %v2796_v11  ;;  %v3586_v14 = vpop.f32.mrb[27].mxu1 }
0x10d2   : > { %v2902_v7 = vadd.f32 %v2899_v13, %v4224_v62  ;;  %v3302_v62 = vld [vmem:[%s4490_s6 + $0x30] sm:$0xff] }
0x10d3   : > { %v3651_v27 = vpack.c.bf16 %v3303_v26, %v3302_v62 }
0x10d4   : > { %v2903_v15 = vsel %vm370_vm0, %v2902_v7, 0.0 }
0x10d5   : > { %2904 = vadd.xlane.f32.xlu1 %v2903_v15  ;;  %3652 = vmatpush3.bf16.msra.mxu0 %v3651_v27 }
0x1162   : > { %v2905_v16 = vpop.xlane.xlu1 %2904 }
0x1163   : > { %v2906_v18 = vmul.f32 0.03125, %v2905_v16 }
0x1165   : > { %v2907_v19 = vsub.f32 %v2902_v7, %v2906_v18 }
0x1167   : > { %v2908_v38 = vmul.f32 %v2907_v19, %v2907_v19 }
0x1169   : > { %v2909_v20 = vsel %vm370_vm0, %v2908_v38, 0.0 }
0x116a   : > { %2910 = vadd.xlane.f32.xlu1 %v2909_v20 }
0x11f7   : > { %v2911_v29 = vpop.xlane.xlu1 %2910 }
0x11f8   : > { %v2912_v31 = vmul.f32 0.03125, %v2911_v29 }
0x11fa   : > { %v2913_v32 = vadd.f32 1e-12, %v2912_v31 }
0x11fc   : > { %3750 = vrsqrt.f32 %v2913_v32 }
0x1206   : > { %v3751_v35 = vpop.eup %3750 }
0x1207   : > { %v2915_v36 = vmul.f32 %v3751_v35, %v2907_v19  ;;  %v3129_v19 = vrot.slane %v4369_v10, %v1761_v56 }
0x1209   : > { %v2920_v39 = vmul.f32 %v2919_v33, %v2915_v36 }
0x120b   : > { %v2925_v40 = vadd.f32 %v2924_v37, %v2920_v39 }
0x120d   : > { %3596 = vmatmul.mubr.msk.f32.vlgmr.msra.gmra.mrb[36].mxu0 %vm370_vm0, %v2925_v40 }
0x12e0   : > { %v3008_v57 = vpop.f32.mrb[36].mxu0 }
0x12e1   : > { %v3009_v58 = vadd.f32 %v3305_v53, %v3008_v57  ;;  %v3597_v59 = vpop.f32.mrb[37].mxu0 }
0x12e3   : > { %v3012_v49 = vmul.f32 %v3009_v58, %v3009_v58 }
0x12e5   : > { %v3013_v46 = vmul.f32 %v3012_v49, %v3009_v58 }
0x12e7   : > { %v3014_v17 = vmul.f32 0.044715, %v3013_v46 }
0x12e9   : > { %v3015_v60 = vadd.f32 %v3014_v17, %v3009_v58 }
0x12eb   : > { %v3016_v61 = vmul.f32 0.7978846, %v3015_v60 }
0x12ed   : > { %3752 = vtanh.f32 %v3016_v61 }
0x12f7   : > { %v3753_v48 = vpop.eup %3752 }
0x12f8   : > { %v3018_v63 = vadd.f32 1.0, %v3753_v48 }
0x12fa   : > { %v3019_v0 = vmul.f32 0.5, %v3018_v63 }
0x12fc   : > { %v3020_v34 = vmul.f32 %v3019_v0, %v3009_v58 }
0x12fe   : > { %3615 = vmatmul.mubr.msk.f32.vlgmr.msra.gmra.mrb[28].mxu1 %vm1666_vm3, %v3020_v34 }
0x13d1   : > { %v3103_v2 = vpop.f32.mrb[28].mxu1 }
0x13d2   : > { %v3104_v3 = vadd.f32 %v3103_v2, %v3033_v1  ;;  %v3616_v4 = vpop.f32.mrb[29].mxu1 }
0x13d4   : > { %v3107_v5 = vadd.f32 %v3104_v3, %v2925_v40 }
0x13d6   : > { %v3108_v6 = vsel %vm370_vm0, %v3107_v5, 0.0 }
0x13d7   : > { %3109 = vadd.xlane.f32.xlu0 %v3108_v6 }
0x1464   : > { %v3110_v8 = vpop.xlane.xlu0 %3109 }
0x1465   : > { %v3111_v9 = vmul.f32 0.03125, %v3110_v8 }
0x1467   : > { %v3112_v11 = vsub.f32 %v3107_v5, %v3111_v9 }
0x1469   : > { %v3113_v12 = vmul.f32 %v3112_v11, %v3112_v11 }
0x146b   : > { %v3114_v13 = vsel %vm370_vm0, %v3113_v12, 0.0 }
0x146c   : > { %3115 = vadd.xlane.f32.xlu1 %v3114_v13 }
0x14f9   : > { %v3116_v14 = vpop.xlane.xlu1 %3115 }
0x14fa   : > { %v3117_v7 = vmul.f32 0.03125, %v3116_v14 }
0x14fc   : > { %v3118_v15 = vadd.f32 1e-12, %v3117_v7 }
0x14fe   : > { %3754 = vrsqrt.f32 %v3118_v15 }
0x1508   : > { %v3755_v16 = vpop.eup %3754 }
0x1509   : > { %v3120_v18 = vmul.f32 %v3755_v16, %v3112_v11 }
0x150b   : > { %v3125_v38 = vmul.f32 %v3124_v28, %v3120_v18 }
0x150d   : > { %v3130_v20 = vadd.f32 %v3129_v19, %v3125_v38 }
0x150f   : > { %3132 = vst.msk [vmem:[%s360_s18] sm:$0x1] %vm3131_vm4, %v3130_v20 }
0x1510   : > { %3769 = shalt.err (!%p3766_p3)
}
0x1511   : > { %s3770_s11 = scalar_lea.hbm %s4442_s26, 16  ;;  %s3774_s25 = scalar_lea.hbm %s4494_s10, 32 }
0x1512   : > { %p3771_p4 = scmp.ne.s32.totalorder %s4442_s26, %s3770_s11  ;;  %p3775_p9 = scmp.lt.u32.totalorder %s4442_s26, %s4494_s10 }
0x1513   : > { %p3776_p10 = scmp.lt.u32.totalorder %s3774_s25, %s3770_s11  ;;  %p3778_p12 = scmp.lt.u32.totalorder %s3770_s11, %s4442_s26 }
0x1514   : > { %p3772_p7 = pnand %p3771_p4, %p3918_p5 }
0x1515   : > { %p3777_p11 = por %p3776_p10, %p3775_p9 }
0x1516   : > { %p3773_p8 = pneg %p3772_p7 }
0x1517   : > { %p3779_p13 = por %p3778_p12, %p3777_p11 }
0x1519   : > { %p3780_p0 = pnand %p3779_p13, %p3773_p8 }
0x151b   : > { %3783 = shalt.err (!%p3780_p0)
}
0x151c   : > { %3665 = dma.vmem_to_hbm [thread:$0]  (%p3918_p5), %s4444_s20, 16, %s4442_s26, %s3134_s27  }
0x151d PF: > { %p3671_p1 = scmp.ge.s32.totalorder %s3818_s16, 2  ;;  %s3158_s28 = sand.u32 1, %s3806_s13  }
0x151e   : > { %s3159_s29 = scalar_lea.sflag [#allocation3], %s3158_s28 }
0x151f   : > { %p3668_p2 = pnand %p3671_p1, %p3922_p6 }
0x1521   : > { %3801 = dma.done.wait (!%p3668_p2), %s3159_s29, 16  }
0x1522   : > { %3803 = vsyncadd (!%p3668_p2), %s3159_s29, 4294967280  ;;  %p20_p3 = scmp.ge.s32.totalorder %s3905_s19, 4   ;;  %s4497_s13 = smov %s3810_s14 }
0x1523   : > { %s4498_s14 = smov %s3814_s15  ;;  %s4499_s15 = smov %s3916_s22 }
0x1524   : > { %s4500_s16 = smov %s3905_s19  ;;  %22 = sbr.rel (!%p20_p3) target bundleno = 3 (0x3), region = 105 }
0x152b   :  { %3163 = vsyncpa [#allocation3], 1 }
0x152c   :  { %3165 = vsyncpa [#allocation3 + $0x1], 1 }

</bundles_post_ra>
